<compile_context>
chip_gen: v7x
topology: tpu7x:2x2x1
jax: 0.10.0
libtpu: 0.0.40
codegen_flags: <defaults>
</compile_context>

<pallas_src>
import functools

import jax
import jax.numpy as jnp
from jax.experimental import pallas as pl
from jax.experimental.pallas import tpu as pltpu

SMEM_SPEC = pl.BlockSpec(memory_space=pltpu.MemorySpace.SMEM)
VMEM_LIMIT = 32 * 1024 * 1024  # safe on v5e / v6e / v7x


def _round_up(x, m):
    return ((x + m - 1) // m) * m


def _pad_rows(x, n_pad):
    pad = [(0, n_pad - x.shape[0])] + [(0, 0)] * (x.ndim - 1)
    return jnp.pad(x, pad)


def _pad_cols(x, d_pad):
    return jnp.pad(x, ((0, 0), (0, d_pad - x.shape[1])))


def _log_sigmoid(x):
    # Numerically stable log(sigmoid(x)), matches torch.nn.functional.logsigmoid.
    return jnp.minimum(x, 0.0) - jnp.log1p(jnp.exp(-jnp.abs(x)))


# ----------------------------- Pallas kernels -------------------------------

def _encoder_kernel(xpri_ref, xcur_ref, eps_ref, det_ref, w_ref, b_ref,
                    emb_ref, kl_ref, *, e, esp):
    # xpri/xcur: (T, Dpad) = [mean_e | std_e | time | fea | 0-pad]
    # w: (Dpad, 2E) block-diagonal packed [W_mean | W_std];  b: (1, 2E)
    w = w_ref[...].astype(jnp.bfloat16)                  # resident (constant block)
    bias = b_ref[...]                                    # f32
    xp = xpri_ref[...].astype(jnp.bfloat16)
    xc = xcur_ref[...].astype(jnp.bfloat16)

    # 2 MXU dots (bf16 in, f32 acc) replace 4 original matmuls; tanh on VPU/EUP.
    z_pri = jnp.tanh(jnp.dot(xp, w, preferred_element_type=jnp.float32) + bias)
    z_cur = jnp.tanh(jnp.dot(xc, w, preferred_element_type=jnp.float32) + bias)

    mean_pri = z_pri[:, :e]
    std_pri = jnp.exp(0.5 * z_pri[:, e:])                # .mul(0.5).exp()
    mean_cur = z_cur[:, :e]
    std_cur = jnp.exp(0.5 * z_cur[:, e:])

    # reparameterize(mu=mean_cur, logvar=std_cur): keeps the reference's
    # double-exp quirk (std_cur is already exp(0.5*tanh(...))).
    z = mean_cur + eps_ref[...] * jnp.exp(0.5 * std_cur)
    emb_ref[...] = jnp.concatenate([z, det_ref[...]], axis=1)   # lane-dense (T, 2E)

    # Gaussian KL((mean_pri,std_pri) || (mean_cur,std_cur)), per-row sum.
    var1 = std_pri * std_pri + esp
    var2 = std_cur * std_cur + esp
    inv_var2 = 1.0 / var2
    tr = var1 * inv_var2                                 # var1 / var2
    diff = mean_cur - mean_pri
    per = 0.5 * (-jnp.log(tr) - 1.0 + tr + diff * diff * inv_var2)
    kl_ref[...] = jnp.sum(per, axis=1, keepdims=True)


def fused_encoder(x_pri, x_cur, eps, det_emb, w_big, b_big, e,
                  *, row_tile=256, esp=1e-10):
    n, d_pad = x_pri.shape
    tile = min(row_tile, _round_up(n, 8))
    n_pad = _round_up(n, tile)
    x_pri = _pad_rows(x_pri, n_pad)
    x_cur = _pad_rows(x_cur, n_pad)
    eps = _pad_rows(eps, n_pad)
    det_emb = _pad_rows(det_emb, n_pad)

    emb, kl = pl.pallas_call(
        functools.partial(_encoder_kernel, e=e, esp=esp),
        out_shape=(jax.ShapeDtypeStruct((n_pad, 2 * e), jnp.float32),
                   jax.ShapeDtypeStruct((n_pad, 1), jnp.float32)),
        grid=(n_pad // tile,),
        in_specs=[pl.BlockSpec((tile, d_pad), lambda i: (i, 0)),
                  pl.BlockSpec((tile, d_pad), lambda i: (i, 0)),
                  pl.BlockSpec((tile, e), lambda i: (i, 0)),
                  pl.BlockSpec((tile, e), lambda i: (i, 0)),
                  pl.BlockSpec((d_pad, 2 * e), lambda i: (0, 0)),
                  pl.BlockSpec((1, 2 * e), lambda i: (0, 0))],
        out_specs=(pl.BlockSpec((tile, 2 * e), lambda i: (i, 0)),
                   pl.BlockSpec((tile, 1), lambda i: (i, 0))),
        compiler_params=pltpu.CompilerParams(
            dimension_semantics=("parallel",),
            vmem_limit_bytes=VMEM_LIMIT),
    )(x_pri, x_cur, eps, det_emb, w_big, b_big)
    return emb[:n], kl[:n, 0]


def _score_kernel(pu_ref, pi1_ref, pi2_ref, nu_ref, ni1_ref, ni2_ref, o_ref,
                  *, batch, tile):
    i = pl.program_id(0)

    @pl.when(i == 0)
    def _init():
        o_ref[0, 0] = 0.0

    # Mask rows that are pure padding (batch padded up to a tile multiple).
    row = jax.lax.broadcasted_iota(jnp.int32, (tile, 1), 0) + i * tile
    valid = (row < batch).astype(jnp.float32)                        # (T, 1)

    pu, pi1, pi2 = pu_ref[...], pi1_ref[...], pi2_ref[...]           # (T, 2E)
    pos_ls = (_log_sigmoid(jnp.sum(pu * (pi1 + pi2), axis=1, keepdims=True))
              + _log_sigmoid(jnp.sum(pi1 * (pu + pi2), axis=1, keepdims=True))
              + _log_sigmoid(jnp.sum(pi2 * (pu + pi1), axis=1, keepdims=True)))

    nu, ni1, ni2 = nu_ref[...], ni1_ref[...], ni2_ref[...]           # (T, n_neg, 2E)
    neg_ls = (_log_sigmoid(-jnp.sum(nu * pu[:, None, :], axis=2))
              + _log_sigmoid(-jnp.sum(ni1 * pi1[:, None, :], axis=2))
              + _log_sigmoid(-jnp.sum(ni2 * pi2[:, None, :], axis=2)))  # (T, n_neg)

    partial = jnp.sum(valid * pos_ls) + jnp.sum(valid * neg_ls)
    o_ref[0, 0] = o_ref[0, 0] - partial          # u_score + i1_score + i2_score


def fused_bpr_score(pu, pi1, pi2, nu, ni1, ni2, *, row_tile=256):
    b, d2 = pu.shape
    n_neg = nu.shape[1]
    tile = min(row_tile, _round_up(b, 8))
    b_pad = _round_up(b, tile)
    pu, pi1, pi2 = (_pad_rows(x, b_pad) for x in (pu, pi1, pi2))
    nu, ni1, ni2 = (_pad_rows(x, b_pad) for x in (nu, ni1, ni2))

    out = pl.pallas_call(
        functools.partial(_score_kernel, batch=b, tile=tile),
        out_shape=jax.ShapeDtypeStruct((1, 1), jnp.float32),
        grid=(b_pad // tile,),
        in_specs=[pl.BlockSpec((tile, d2), lambda i: (i, 0))] * 3
        + [pl.BlockSpec((tile, n_neg, d2), lambda i: (i, 0, 0))] * 3,
        out_specs=SMEM_SPEC,
        compiler_params=pltpu.CompilerParams(
            dimension_semantics=("arbitrary",),
            vmem_limit_bytes=VMEM_LIMIT),
    )(pu, pi1, pi2, nu, ni1, ni2)
    return out[0, 0]


# ------------------------------ model glue -----------------------------------

def init_params(key, cfg):
    n_users, n_items = cfg['n_users'], cfg['n_items']
    e, t = cfg['emb_dim'], cfg['time_step']
    uf, itf = cfg['user_fea_dim'], cfg['item_fea_dim']
    init_range = 0.1 * e ** (-0.5)
    din_u = e + t + 1 + uf
    din_i = e + t + 1 + itf
    ks = jax.random.split(key, 10)

    def lin(k, din, dout):
        kw, kb = jax.random.split(k)
        bound = 1.0 / float(din) ** 0.5
        w = jax.random.uniform(kw, (din, dout), jnp.float32, -bound, bound)
        b = jax.random.uniform(kb, (1, dout), jnp.float32, -bound, bound)
        return w, b

    params = dict(
        user_emb=jax.random.uniform(ks[0], (n_users, e), jnp.float32, -init_range, init_range),
        item_emb=jax.random.uniform(ks[1], (n_items, e), jnp.float32, -init_range, init_range),
        time_emb=jnp.eye(t + 1, dtype=jnp.float32),
        user_mean=jnp.ones((n_users, e), jnp.float32),      # _weight = ones (kept)
        user_std=jnp.zeros((n_users, e), jnp.float32),      # _weight = zeros (kept)
        item_mean=jax.random.uniform(ks[2], (n_items, e), jnp.float32, -init_range, init_range),
        item_std=jax.random.uniform(ks[3], (n_items, e), jnp.float32, -init_range, init_range),
        user_fea=jax.random.normal(ks[4], (n_users, uf), jnp.float32),
        item_fea=jax.random.normal(ks[5], (n_items, itf), jnp.float32),
    )
    params['w_mean_u'], params['b_mean_u'] = lin(ks[6], din_u, e)
    params['w_std_u'], params['b_std_u'] = lin(ks[7], din_u, e)
    params['w_mean_i'], params['b_mean_i'] = lin(ks[8], din_i, e)
    params['w_std_i'], params['b_std_i'] = lin(ks[9], din_i, e)
    return params


def _build_fused_weights(w_mean, w_std, b_mean, b_std, e, d_pad):
    """Pack W_mean/W_std into one block-diagonal (Dpad, 2E) matrix.

    Input layout of X is [mean_e (E) | std_e (E) | time+fea (rest) | 0-pad]:
      mean output = mean_e @ W_mean[:E] + [time|fea] @ W_mean[E:]
      std  output = std_e  @ W_std[:E]  + [time|fea] @ W_std[E:]
    """
    din = w_mean.shape[0]
    rest = din - e
    w = jnp.zeros((d_pad, 2 * e), jnp.float32)
    w = w.at[:e, :e].set(w_mean[:e])
    w = w.at[e:2 * e, e:].set(w_std[:e])
    w = w.at[2 * e:2 * e + rest, :e].set(w_mean[e:])
    w = w.at[2 * e:2 * e + rest, e:].set(w_std[e:])
    b = jnp.concatenate([b_mean, b_std], axis=1)
    return w.astype(jnp.bfloat16), b        # bf16 weights: full-rate MXU, half DMA


def _gather_build(fea_tbl, mean_tbl, std_tbl, emb_tbl, idx, cur_tl, pri_tl, d_pad):
    mean_e = mean_tbl[idx]
    std_e = std_tbl[idx]
    fea = fea_tbl[idx]
    det = emb_tbl[idx]
    x_cur = _pad_cols(jnp.concatenate([mean_e, std_e, cur_tl, fea], axis=1), d_pad)
    x_pri = _pad_cols(jnp.concatenate([mean_e, std_e, pri_tl, fea], axis=1), d_pad)
    return x_pri, x_cur, det


def tvbr_forward(params, cfg, batch_data, rng):
    pos_u, pos_i_1, pos_i_2, neg_u, neg_i_1, neg_i_2, pos_t, neg_t = batch_data
    e, n_neg, alpha = cfg['emb_dim'], cfg['n_neg'], cfg['alpha']
    t = cfg['time_step']
    bsz = pos_u.shape[0]
    bn = bsz * n_neg

    time_emb = params['time_emb']
    pos_tl = time_emb[pos_t + 1]            # (B, T+1)
    pos_pri_tl = time_emb[pos_t]
    neg_tl = time_emb[neg_t + 1]            # (B*n_neg, T+1)
    neg_pri_tl = time_emb[neg_t]

    neg_u_flat = neg_u.reshape(-1)
    neg_i_1_flat = neg_i_1.reshape(-1)
    neg_i_2_flat = neg_i_2.reshape(-1)

    # ---- batch all user rows (pos + neg) / all item rows into ONE call each ----
    u_idx = jnp.concatenate([pos_u, neg_u_flat])
    u_cur_tl = jnp.concatenate([pos_tl, neg_tl], axis=0)
    u_pri_tl = jnp.concatenate([pos_pri_tl, neg_pri_tl], axis=0)

    i_idx = jnp.concatenate([pos_i_1, pos_i_2, neg_i_1_flat, neg_i_2_flat])
    i_cur_tl = jnp.concatenate([pos_tl, pos_tl, neg_tl, neg_tl], axis=0)
    i_pri_tl = jnp.concatenate([pos_pri_tl, pos_pri_tl, neg_pri_tl, neg_pri_tl], axis=0)

    d_in_u = 2 * e + (t + 1) + cfg['user_fea_dim']
    d_in_i = 2 * e + (t + 1) + cfg['item_fea_dim']
    d_pad_u = _round_up(d_in_u, 128)
    d_pad_i = _round_up(d_in_i, 128)

    wu, bu = _build_fused_weights(params['w_mean_u'], params['w_std_u'],
                                  params['b_mean_u'], params['b_std_u'], e, d_pad_u)
    wi, bi = _build_fused_weights(params['w_mean_i'], params['w_std_i'],
                                  params['b_mean_i'], params['b_std_i'], e, d_pad_i)

    ku, ki = jax.random.split(rng)
    eps_u = jax.random.normal(ku, (u_idx.shape[0], e), jnp.float32)
    eps_i = jax.random.normal(ki, (i_idx.shape[0], e), jnp.float32)

    xu_pri, xu_cur, det_u = _gather_build(params['user_fea'], params['user_mean'],
                                          params['user_std'], params['user_emb'],
                                          u_idx, u_cur_tl, u_pri_tl, d_pad_u)
    xi_pri, xi_cur, det_i = _gather_build(params['item_fea'], params['item_mean'],
                                          params['item_std'], params['item_emb'],
                                          i_idx, i_cur_tl, i_pri_tl, d_pad_i)

    emb_u, kl_u = fused_encoder(xu_pri, xu_cur, eps_u, det_u, wu, bu, e)
    emb_i, kl_i = fused_encoder(xi_pri, xi_cur, eps_i, det_i, wi, bi, e)

    pos_u_emb = emb_u[:bsz]
    neg_u_emb = emb_u[bsz:].reshape(bsz, n_neg, 2 * e)
    pos_i_1_emb = emb_i[:bsz]
    pos_i_2_emb = emb_i[bsz:2 * bsz]
    neg_i_1_emb = emb_i[2 * bsz:2 * bsz + bn].reshape(bsz, n_neg, 2 * e)
    neg_i_2_emb = emb_i[2 * bsz + bn:].reshape(bsz, n_neg, 2 * e)

    pos_u_kl = jnp.mean(kl_u[:bsz])
    neg_u_kl = jnp.mean(kl_u[bsz:])
    pos_i_1_kl = jnp.mean(kl_i[:bsz])
    pos_i_2_kl = jnp.mean(kl_i[bsz:2 * bsz])
    neg_i_1_kl = jnp.mean(kl_i[2 * bsz:2 * bsz + bn])
    neg_i_2_kl = jnp.mean(kl_i[2 * bsz + bn:])

    # one fused pass over the batch for all three BPR scores
    rec_sum = fused_bpr_score(pos_u_emb, pos_i_1_emb, pos_i_2_emb,
                              neg_u_emb, neg_i_1_emb, neg_i_2_emb)
    rec_loss = rec_sum / (3.0 * cfg['batch_size'])
    # Sign/scale matches the reference module exactly: the 0.5 factor is inside
    # kl_div and the forward applies an additional outer -0.5.
    kl_loss = -0.5 * (pos_u_kl + pos_i_1_kl + pos_i_2_kl
                      + neg_u_kl + neg_i_1_kl + neg_i_2_kl)
    return (1.0 - alpha) * rec_loss + alpha * kl_loss


# ------------------------------- demo ----------------------------------------

if __name__ == "__main__":
    cfg = dict(n_users=20, n_items=30, late_dim=64, emb_dim=32, n_neg=3,
               batch_size=8, alpha=0.1, time_step=4, activator='tanh',
               user_fea_dim=16, item_fea_dim=16)

    key = jax.random.PRNGKey(0)
    pkey, dkey, rkey = jax.random.split(key, 3)
    params = init_params(pkey, cfg)

    B, n_neg, T = cfg['batch_size'], cfg['n_neg'], cfg['time_step']
    ks = jax.random.split(dkey, 8)
    pos_u = jax.random.randint(ks[0], (B,), 0, cfg['n_users'])
    pos_i_1 = jax.random.randint(ks[1], (B,), 0, cfg['n_items'])
    pos_i_2 = jax.random.randint(ks[2], (B,), 0, cfg['n_items'])
    neg_u = jax.random.randint(ks[3], (B, n_neg), 0, cfg['n_users'])
    neg_i_1 = jax.random.randint(ks[4], (B, n_neg), 0, cfg['n_items'])
    neg_i_2 = jax.random.randint(ks[5], (B, n_neg), 0, cfg['n_items'])
    pos_t = jax.random.randint(ks[6], (B,), 0, T)             # pos_t + 1 <= time_step
    neg_t = jax.random.randint(ks[7], (B * n_neg,), 0, T)

    batch = (pos_u, pos_i_1, pos_i_2, neg_u, neg_i_1, neg_i_2, pos_t, neg_t)

    fwd = jax.jit(lambda p, bd, k: tvbr_forward(p, cfg, bd, k))
    loss = fwd(params, batch, rkey)
    jax.block_until_ready(loss)
    print("KERNEL_OK")
</pallas_src>

<mosaic_0001>
module attributes {stable_mosaic.version = 11 : i64} {
  func.func @_encoder_kernel(%arg0: i32, %arg1: memref<64x128xf32, #tpu.memory_space<vmem>>, %arg2: memref<64x128xf32, #tpu.memory_space<vmem>>, %arg3: memref<64x32xf32, #tpu.memory_space<vmem>>, %arg4: memref<64x32xf32, #tpu.memory_space<vmem>>, %arg5: memref<128x64xbf16, #tpu.memory_space<vmem>>, %arg6: memref<1x64xf32, #tpu.memory_space<vmem>>, %arg7: memref<64x64xf32, #tpu.memory_space<vmem>>, %arg8: memref<64x1xf32, #tpu.memory_space<vmem>>) attributes {dimension_semantics = [#tpu.dimension_semantics<parallel>], iteration_bounds = array<i64: 1>, scalar_prefetch = 0 : i64, scratch_operands = 0 : i64, tpu.core_type = #tpu.core_type<tc>, window_params = [{transform_indices = @transform_0, window_bounds = array<i64: 64, 128>}, {transform_indices = @transform_1, window_bounds = array<i64: 64, 128>}, {transform_indices = @transform_2, window_bounds = array<i64: 64, 32>}, {transform_indices = @transform_3, window_bounds = array<i64: 64, 32>}, {pipeline_mode = #tpu.pipeline_mode<synchronous>, transform_indices = @transform_4, window_bounds = array<i64: 128, 64>}, {pipeline_mode = #tpu.pipeline_mode<synchronous>, transform_indices = @transform_5, window_bounds = array<i64: 1, 64>}, {transform_indices = @transform_6, window_bounds = array<i64: 64, 64>}, {transform_indices = @transform_7, window_bounds = array<i64: 64, 1>}]} {
    %c0 = arith.constant 0 : index
    %c0_0 = arith.constant 0 : index
    %0 = vector.load %arg5[%c0, %c0_0] : memref<128x64xbf16, #tpu.memory_space<vmem>>, vector<128x64xbf16>
    %c0_1 = arith.constant 0 : index
    %c0_2 = arith.constant 0 : index
    %1 = vector.load %arg6[%c0_1, %c0_2] : memref<1x64xf32, #tpu.memory_space<vmem>>, vector<1x64xf32>
    %c0_3 = arith.constant 0 : index
    %c0_4 = arith.constant 0 : index
    %2 = vector.load %arg1[%c0_3, %c0_4] : memref<64x128xf32, #tpu.memory_space<vmem>>, vector<64x128xf32>
    %3 = arith.truncf %2 : vector<64x128xf32> to vector<64x128xbf16>
    %c0_5 = arith.constant 0 : index
    %c0_6 = arith.constant 0 : index
    %4 = vector.load %arg2[%c0_5, %c0_6] : memref<64x128xf32, #tpu.memory_space<vmem>>, vector<64x128xf32>
    %5 = arith.truncf %4 : vector<64x128xf32> to vector<64x128xbf16>
    %cst = arith.constant dense<0.000000e+00> : vector<64x64xf32>
    %6 = tpu.matmul %3, %0, %cst {dimension_numbers = #tpu.dot_dimension_numbers<[1], [0], [0], [1], [0, 0, 1, 1], [], []>} : vector<64x128xbf16>, vector<128x64xbf16>, vector<64x64xf32> -> vector<64x64xf32>
    %7 = vector.broadcast %1 : vector<1x64xf32> to vector<64x64xf32>
    %8 = arith.addf %6, %7 : vector<64x64xf32>
    %9 = math.tanh %8 : vector<64x64xf32>
    %cst_7 = arith.constant dense<0.000000e+00> : vector<64x64xf32>
    %10 = tpu.matmul %5, %0, %cst_7 {dimension_numbers = #tpu.dot_dimension_numbers<[1], [0], [0], [1], [0, 0, 1, 1], [], []>} : vector<64x128xbf16>, vector<128x64xbf16>, vector<64x64xf32> -> vector<64x64xf32>
    %11 = vector.broadcast %1 : vector<1x64xf32> to vector<64x64xf32>
    %12 = arith.addf %10, %11 : vector<64x64xf32>
    %13 = math.tanh %12 : vector<64x64xf32>
    %14 = vector.extract_strided_slice %9 {offsets = [0, 0], sizes = [64, 32], strides = [1, 1]} : vector<64x64xf32> to vector<64x32xf32>
    %15 = vector.extract_strided_slice %9 {offsets = [0, 32], sizes = [64, 32], strides = [1, 1]} : vector<64x64xf32> to vector<64x32xf32>
    %cst_8 = arith.constant 5.000000e-01 : f32
    %16 = vector.broadcast %cst_8 : f32 to vector<64x32xf32>
    %17 = arith.mulf %16, %15 : vector<64x32xf32>
    %18 = math.exp %17 : vector<64x32xf32>
    %19 = vector.extract_strided_slice %13 {offsets = [0, 0], sizes = [64, 32], strides = [1, 1]} : vector<64x64xf32> to vector<64x32xf32>
    %20 = vector.extract_strided_slice %13 {offsets = [0, 32], sizes = [64, 32], strides = [1, 1]} : vector<64x64xf32> to vector<64x32xf32>
    %cst_9 = arith.constant 5.000000e-01 : f32
    %21 = vector.broadcast %cst_9 : f32 to vector<64x32xf32>
    %22 = arith.mulf %21, %20 : vector<64x32xf32>
    %23 = math.exp %22 : vector<64x32xf32>
    %c0_10 = arith.constant 0 : index
    %c0_11 = arith.constant 0 : index
    %24 = vector.load %arg3[%c0_10, %c0_11] : memref<64x32xf32, #tpu.memory_space<vmem>>, vector<64x32xf32>
    %cst_12 = arith.constant 5.000000e-01 : f32
    %25 = vector.broadcast %cst_12 : f32 to vector<64x32xf32>
    %26 = arith.mulf %25, %23 : vector<64x32xf32>
    %27 = math.exp %26 : vector<64x32xf32>
    %28 = arith.mulf %24, %27 : vector<64x32xf32>
    %29 = arith.addf %19, %28 : vector<64x32xf32>
    %c0_13 = arith.constant 0 : index
    %c0_14 = arith.constant 0 : index
    %30 = vector.load %arg4[%c0_13, %c0_14] : memref<64x32xf32, #tpu.memory_space<vmem>>, vector<64x32xf32>
    %31 = tpu.concatenate %29, %30 in 1 : vector<64x32xf32>, vector<64x32xf32> -> vector<64x64xf32>
    %c0_15 = arith.constant 0 : index
    %c0_16 = arith.constant 0 : index
    %32 = vector.load %arg7[%c0_15, %c0_16] : memref<64x64xf32, #tpu.memory_space<vmem>>, vector<64x64xf32>
    tpu.vector_store %arg7[%c0_15, %c0_16], %31 {strides = array<i32>} : memref<64x64xf32, #tpu.memory_space<vmem>>, vector<64x64xf32>,
    %33 = arith.mulf %18, %18 : vector<64x32xf32>
    %cst_17 = arith.constant 1.000000e-10 : f32
    %34 = vector.broadcast %cst_17 : f32 to vector<64x32xf32>
    %35 = arith.addf %33, %34 : vector<64x32xf32>
    %36 = arith.mulf %23, %23 : vector<64x32xf32>
    %cst_18 = arith.constant 1.000000e-10 : f32
    %37 = vector.broadcast %cst_18 : f32 to vector<64x32xf32>
    %38 = arith.addf %36, %37 : vector<64x32xf32>
    %cst_19 = arith.constant 1.000000e+00 : f32
    %39 = vector.broadcast %cst_19 : f32 to vector<64x32xf32>
    %40 = arith.divf %39, %38 : vector<64x32xf32>
    %41 = arith.mulf %35, %40 : vector<64x32xf32>
    %42 = arith.subf %19, %14 : vector<64x32xf32>
    %43 = math.log %41 : vector<64x32xf32>
    %cst_20 = arith.constant 0.000000e+00 : f32
    %44 = vector.broadcast %cst_20 : f32 to vector<64x32xf32>
    %45 = arith.subf %44, %43 : vector<64x32xf32>
    %cst_21 = arith.constant 1.000000e+00 : f32
    %46 = vector.broadcast %cst_21 : f32 to vector<64x32xf32>
    %47 = arith.subf %45, %46 : vector<64x32xf32>
    %48 = arith.addf %47, %41 : vector<64x32xf32>
    %49 = arith.mulf %42, %42 : vector<64x32xf32>
    %50 = arith.mulf %49, %40 : vector<64x32xf32>
    %51 = arith.addf %48, %50 : vector<64x32xf32>
    %cst_22 = arith.constant 5.000000e-01 : f32
    %52 = vector.broadcast %cst_22 : f32 to vector<64x32xf32>
    %53 = arith.mulf %52, %51 : vector<64x32xf32>
    %cst_23 = arith.constant dense<0.000000e+00> : vector<64xf32>
    %54 = vector.multi_reduction <add>, %53, %cst_23 [1] : vector<64x32xf32> to vector<64xf32>
    %55 = vector.shape_cast %54 : vector<64xf32> to vector<64x1xf32>
    %c0_24 = arith.constant 0 : index
    %c0_25 = arith.constant 0 : index
    %56 = vector.load %arg8[%c0_24, %c0_25] : memref<64x1xf32, #tpu.memory_space<vmem>>, vector<64x1xf32>
    tpu.vector_store %arg8[%c0_24, %c0_25], %55 {strides = array<i32>} : memref<64x1xf32, #tpu.memory_space<vmem>>, vector<64x1xf32>,
    return
  }
  func.func @transform_0(%arg0: i32) -> (i32, i32) {
    %c0_i32 = arith.constant 0 : i32
    %c0_i32_0 = arith.constant 0 : i32
    return %arg0, %c0_i32 : i32, i32
  }
  func.func @transform_1(%arg0: i32) -> (i32, i32) {
    %c0_i32 = arith.constant 0 : i32
    %c0_i32_0 = arith.constant 0 : i32
    return %arg0, %c0_i32 : i32, i32
  }
  func.func @transform_2(%arg0: i32) -> (i32, i32) {
    %c0_i32 = arith.constant 0 : i32
    %c0_i32_0 = arith.constant 0 : i32
    return %arg0, %c0_i32 : i32, i32
  }
  func.func @transform_3(%arg0: i32) -> (i32, i32) {
    %c0_i32 = arith.constant 0 : i32
    %c0_i32_0 = arith.constant 0 : i32
    return %arg0, %c0_i32 : i32, i32
  }
  func.func @transform_4(%arg0: i32) -> (i32, i32) {
    %c0_i32 = arith.constant 0 : i32
    %c0_i32_0 = arith.constant 0 : i32
    %c0_i32_1 = arith.constant 0 : i32
    return %c0_i32, %c0_i32_0 : i32, i32
  }
  func.func @transform_5(%arg0: i32) -> (i32, i32) {
    %c0_i32 = arith.constant 0 : i32
    %c0_i32_0 = arith.constant 0 : i32
    %c0_i32_1 = arith.constant 0 : i32
    return %c0_i32, %c0_i32_0 : i32, i32
  }
  func.func @transform_6(%arg0: i32) -> (i32, i32) {
    %c0_i32 = arith.constant 0 : i32
    %c0_i32_0 = arith.constant 0 : i32
    return %arg0, %c0_i32 : i32, i32
  }
  func.func @transform_7(%arg0: i32) -> (i32, i32) {
    %c0_i32 = arith.constant 0 : i32
    %c0_i32_0 = arith.constant 0 : i32
    return %arg0, %c0_i32 : i32, i32
  }
}

module attributes {stable_mosaic.version = 11 : i64} {
  func.func @_encoder_kernel(%arg0: i32, %arg1: memref<32x128xf32, #tpu.memory_space<vmem>>, %arg2: memref<32x128xf32, #tpu.memory_space<vmem>>, %arg3: memref<32x32xf32, #tpu.memory_space<vmem>>, %arg4: memref<32x32xf32, #tpu.memory_space<vmem>>, %arg5: memref<128x64xbf16, #tpu.memory_space<vmem>>, %arg6: memref<1x64xf32, #tpu.memory_space<vmem>>, %arg7: memref<32x64xf32, #tpu.memory_space<vmem>>, %arg8: memref<32x1xf32, #tpu.memory_space<vmem>>) attributes {dimension_semantics = [#tpu.dimension_semantics<parallel>], iteration_bounds = array<i64: 1>, scalar_prefetch = 0 : i64, scratch_operands = 0 : i64, tpu.core_type = #tpu.core_type<tc>, window_params = [{transform_indices = @transform_0, window_bounds = array<i64: 32, 128>}, {transform_indices = @transform_1, window_bounds = array<i64: 32, 128>}, {transform_indices = @transform_2, window_bounds = array<i64: 32, 32>}, {transform_indices = @transform_3, window_bounds = array<i64: 32, 32>}, {pipeline_mode = #tpu.pipeline_mode<synchronous>, transform_indices = @transform_4, window_bounds = array<i64: 128, 64>}, {pipeline_mode = #tpu.pipeline_mode<synchronous>, transform_indices = @transform_5, window_bounds = array<i64: 1, 64>}, {transform_indices = @transform_6, window_bounds = array<i64: 32, 64>}, {transform_indices = @transform_7, window_bounds = array<i64: 32, 1>}]} {
    %c0 = arith.constant 0 : index
    %c0_0 = arith.constant 0 : index
    %0 = vector.load %arg5[%c0, %c0_0] : memref<128x64xbf16, #tpu.memory_space<vmem>>, vector<128x64xbf16>
    %c0_1 = arith.constant 0 : index
    %c0_2 = arith.constant 0 : index
    %1 = vector.load %arg6[%c0_1, %c0_2] : memref<1x64xf32, #tpu.memory_space<vmem>>, vector<1x64xf32>
    %c0_3 = arith.constant 0 : index
    %c0_4 = arith.constant 0 : index
    %2 = vector.load %arg1[%c0_3, %c0_4] : memref<32x128xf32, #tpu.memory_space<vmem>>, vector<32x128xf32>
    %3 = arith.truncf %2 : vector<32x128xf32> to vector<32x128xbf16>
    %c0_5 = arith.constant 0 : index
    %c0_6 = arith.constant 0 : index
    %4 = vector.load %arg2[%c0_5, %c0_6] : memref<32x128xf32, #tpu.memory_space<vmem>>, vector<32x128xf32>
    %5 = arith.truncf %4 : vector<32x128xf32> to vector<32x128xbf16>
    %cst = arith.constant dense<0.000000e+00> : vector<32x64xf32>
    %6 = tpu.matmul %3, %0, %cst {dimension_numbers = #tpu.dot_dimension_numbers<[1], [0], [0], [1], [0, 0, 1, 1], [], []>} : vector<32x128xbf16>, vector<128x64xbf16>, vector<32x64xf32> -> vector<32x64xf32>
    %7 = vector.broadcast %1 : vector<1x64xf32> to vector<32x64xf32>
    %8 = arith.addf %6, %7 : vector<32x64xf32>
    %9 = math.tanh %8 : vector<32x64xf32>
    %cst_7 = arith.constant dense<0.000000e+00> : vector<32x64xf32>
    %10 = tpu.matmul %5, %0, %cst_7 {dimension_numbers = #tpu.dot_dimension_numbers<[1], [0], [0], [1], [0, 0, 1, 1], [], []>} : vector<32x128xbf16>, vector<128x64xbf16>, vector<32x64xf32> -> vector<32x64xf32>
    %11 = vector.broadcast %1 : vector<1x64xf32> to vector<32x64xf32>
    %12 = arith.addf %10, %11 : vector<32x64xf32>
    %13 = math.tanh %12 : vector<32x64xf32>
    %14 = vector.extract_strided_slice %9 {offsets = [0, 0], sizes = [32, 32], strides = [1, 1]} : vector<32x64xf32> to vector<32x32xf32>
    %15 = vector.extract_strided_slice %9 {offsets = [0, 32], sizes = [32, 32], strides = [1, 1]} : vector<32x64xf32> to vector<32x32xf32>
    %cst_8 = arith.constant 5.000000e-01 : f32
    %16 = vector.broadcast %cst_8 : f32 to vector<32x32xf32>
    %17 = arith.mulf %16, %15 : vector<32x32xf32>
    %18 = math.exp %17 : vector<32x32xf32>
    %19 = vector.extract_strided_slice %13 {offsets = [0, 0], sizes = [32, 32], strides = [1, 1]} : vector<32x64xf32> to vector<32x32xf32>
    %20 = vector.extract_strided_slice %13 {offsets = [0, 32], sizes = [32, 32], strides = [1, 1]} : vector<32x64xf32> to vector<32x32xf32>
    %cst_9 = arith.constant 5.000000e-01 : f32
    %21 = vector.broadcast %cst_9 : f32 to vector<32x32xf32>
    %22 = arith.mulf %21, %20 : vector<32x32xf32>
    %23 = math.exp %22 : vector<32x32xf32>
    %c0_10 = arith.constant 0 : index
    %c0_11 = arith.constant 0 : index
    %24 = vector.load %arg3[%c0_10, %c0_11] : memref<32x32xf32, #tpu.memory_space<vmem>>, vector<32x32xf32>
    %cst_12 = arith.constant 5.000000e-01 : f32
    %25 = vector.broadcast %cst_12 : f32 to vector<32x32xf32>
    %26 = arith.mulf %25, %23 : vector<32x32xf32>
    %27 = math.exp %26 : vector<32x32xf32>
    %28 = arith.mulf %24, %27 : vector<32x32xf32>
    %29 = arith.addf %19, %28 : vector<32x32xf32>
    %c0_13 = arith.constant 0 : index
    %c0_14 = arith.constant 0 : index
    %30 = vector.load %arg4[%c0_13, %c0_14] : memref<32x32xf32, #tpu.memory_space<vmem>>, vector<32x32xf32>
    %31 = tpu.concatenate %29, %30 in 1 : vector<32x32xf32>, vector<32x32xf32> -> vector<32x64xf32>
    %c0_15 = arith.constant 0 : index
    %c0_16 = arith.constant 0 : index
    %32 = vector.load %arg7[%c0_15, %c0_16] : memref<32x64xf32, #tpu.memory_space<vmem>>, vector<32x64xf32>
    tpu.vector_store %arg7[%c0_15, %c0_16], %31 {strides = array<i32>} : memref<32x64xf32, #tpu.memory_space<vmem>>, vector<32x64xf32>,
    %33 = arith.mulf %18, %18 : vector<32x32xf32>
    %cst_17 = arith.constant 1.000000e-10 : f32
    %34 = vector.broadcast %cst_17 : f32 to vector<32x32xf32>
    %35 = arith.addf %33, %34 : vector<32x32xf32>
    %36 = arith.mulf %23, %23 : vector<32x32xf32>
    %cst_18 = arith.constant 1.000000e-10 : f32
    %37 = vector.broadcast %cst_18 : f32 to vector<32x32xf32>
    %38 = arith.addf %36, %37 : vector<32x32xf32>
    %cst_19 = arith.constant 1.000000e+00 : f32
    %39 = vector.broadcast %cst_19 : f32 to vector<32x32xf32>
    %40 = arith.divf %39, %38 : vector<32x32xf32>
    %41 = arith.mulf %35, %40 : vector<32x32xf32>
    %42 = arith.subf %19, %14 : vector<32x32xf32>
    %43 = math.log %41 : vector<32x32xf32>
    %cst_20 = arith.constant 0.000000e+00 : f32
    %44 = vector.broadcast %cst_20 : f32 to vector<32x32xf32>
    %45 = arith.subf %44, %43 : vector<32x32xf32>
    %cst_21 = arith.constant 1.000000e+00 : f32
    %46 = vector.broadcast %cst_21 : f32 to vector<32x32xf32>
    %47 = arith.subf %45, %46 : vector<32x32xf32>
    %48 = arith.addf %47, %41 : vector<32x32xf32>
    %49 = arith.mulf %42, %42 : vector<32x32xf32>
    %50 = arith.mulf %49, %40 : vector<32x32xf32>
    %51 = arith.addf %48, %50 : vector<32x32xf32>
    %cst_22 = arith.constant 5.000000e-01 : f32
    %52 = vector.broadcast %cst_22 : f32 to vector<32x32xf32>
    %53 = arith.mulf %52, %51 : vector<32x32xf32>
    %cst_23 = arith.constant dense<0.000000e+00> : vector<32xf32>
    %54 = vector.multi_reduction <add>, %53, %cst_23 [1] : vector<32x32xf32> to vector<32xf32>
    %55 = vector.shape_cast %54 : vector<32xf32> to vector<32x1xf32>
    %c0_24 = arith.constant 0 : index
    %c0_25 = arith.constant 0 : index
    %56 = vector.load %arg8[%c0_24, %c0_25] : memref<32x1xf32, #tpu.memory_space<vmem>>, vector<32x1xf32>
    tpu.vector_store %arg8[%c0_24, %c0_25], %55 {strides = array<i32>} : memref<32x1xf32, #tpu.memory_space<vmem>>, vector<32x1xf32>,
    return
  }
  func.func @transform_0(%arg0: i32) -> (i32, i32) {
    %c0_i32 = arith.constant 0 : i32
    %c0_i32_0 = arith.constant 0 : i32
    return %arg0, %c0_i32 : i32, i32
  }
  func.func @transform_1(%arg0: i32) -> (i32, i32) {
    %c0_i32 = arith.constant 0 : i32
    %c0_i32_0 = arith.constant 0 : i32
    return %arg0, %c0_i32 : i32, i32
  }
  func.func @transform_2(%arg0: i32) -> (i32, i32) {
    %c0_i32 = arith.constant 0 : i32
    %c0_i32_0 = arith.constant 0 : i32
    return %arg0, %c0_i32 : i32, i32
  }
  func.func @transform_3(%arg0: i32) -> (i32, i32) {
    %c0_i32 = arith.constant 0 : i32
    %c0_i32_0 = arith.constant 0 : i32
    return %arg0, %c0_i32 : i32, i32
  }
  func.func @transform_4(%arg0: i32) -> (i32, i32) {
    %c0_i32 = arith.constant 0 : i32
    %c0_i32_0 = arith.constant 0 : i32
    %c0_i32_1 = arith.constant 0 : i32
    return %c0_i32, %c0_i32_0 : i32, i32
  }
  func.func @transform_5(%arg0: i32) -> (i32, i32) {
    %c0_i32 = arith.constant 0 : i32
    %c0_i32_0 = arith.constant 0 : i32
    %c0_i32_1 = arith.constant 0 : i32
    return %c0_i32, %c0_i32_0 : i32, i32
  }
  func.func @transform_6(%arg0: i32) -> (i32, i32) {
    %c0_i32 = arith.constant 0 : i32
    %c0_i32_0 = arith.constant 0 : i32
    return %arg0, %c0_i32 : i32, i32
  }
  func.func @transform_7(%arg0: i32) -> (i32, i32) {
    %c0_i32 = arith.constant 0 : i32
    %c0_i32_0 = arith.constant 0 : i32
    return %arg0, %c0_i32 : i32, i32
  }
}

module attributes {stable_mosaic.version = 11 : i64} {
  func.func @_score_kernel(%arg0: i32, %arg1: memref<8x64xf32, #tpu.memory_space<vmem>>, %arg2: memref<8x64xf32, #tpu.memory_space<vmem>>, %arg3: memref<8x64xf32, #tpu.memory_space<vmem>>, %arg4: memref<8x3x64xf32, #tpu.memory_space<vmem>>, %arg5: memref<8x3x64xf32, #tpu.memory_space<vmem>>, %arg6: memref<8x3x64xf32, #tpu.memory_space<vmem>>, %arg7: memref<1x1xf32, #tpu.memory_space<smem>>) attributes {dimension_semantics = [#tpu.dimension_semantics<arbitrary>], iteration_bounds = array<i64: 1>, scalar_prefetch = 0 : i64, scratch_operands = 0 : i64, tpu.core_type = #tpu.core_type<tc>, window_params = [{transform_indices = @transform_0, window_bounds = array<i64: 8, 64>}, {transform_indices = @transform_1, window_bounds = array<i64: 8, 64>}, {transform_indices = @transform_2, window_bounds = array<i64: 8, 64>}, {transform_indices = @transform_3, window_bounds = array<i64: 8, 3, 64>}, {transform_indices = @transform_4, window_bounds = array<i64: 8, 3, 64>}, {transform_indices = @transform_5, window_bounds = array<i64: 8, 3, 64>}, {transform_indices = @transform_6, window_bounds = array<i64: 1, 1>}]} {
    %c0_i32 = arith.constant 0 : i32
    %0 = arith.cmpi eq, %arg0, %c0_i32 : i32
    %1 = arith.extui %0 : i1 to i32
    %c0_i32_0 = arith.constant 0 : i32
    %2 = arith.cmpi ne, %1, %c0_i32_0 : i32
    scf.if %2 {
      %cst_42 = arith.constant 0.000000e+00 : f32
      %c0_43 = arith.constant 0 : index
      %c0_44 = arith.constant 0 : index
      %114 = memref.load %arg7[%c0_43, %c0_44] : memref<1x1xf32, #tpu.memory_space<smem>>
      memref.store %cst_42, %arg7[%c0_43, %c0_44] : memref<1x1xf32, #tpu.memory_space<smem>>
    } else {
    }
    %3 = tpu.iota {dimensions = array<i32: 0>} : vector<8x1xi32>
    %c8_i32 = arith.constant 8 : i32
    %4 = arith.muli %arg0, %c8_i32 : i32
    %5 = vector.broadcast %4 : i32 to vector<8x1xi32>
    %6 = arith.addi %3, %5 : vector<8x1xi32>
    %c8_i32_1 = arith.constant 8 : i32
    %7 = vector.broadcast %c8_i32_1 : i32 to vector<8x1xi32>
    %8 = arith.cmpi slt, %6, %7 : vector<8x1xi32>
    %9 = arith.extui %8 : vector<8x1xi1> to vector<8x1xi32>
    %10 = arith.sitofp %9 : vector<8x1xi32> to vector<8x1xf32>
    %c0 = arith.constant 0 : index
    %c0_2 = arith.constant 0 : index
    %11 = vector.load %arg1[%c0, %c0_2] : memref<8x64xf32, #tpu.memory_space<vmem>>, vector<8x64xf32>
    %c0_3 = arith.constant 0 : index
    %c0_4 = arith.constant 0 : index
    %12 = vector.load %arg2[%c0_3, %c0_4] : memref<8x64xf32, #tpu.memory_space<vmem>>, vector<8x64xf32>
    %c0_5 = arith.constant 0 : index
    %c0_6 = arith.constant 0 : index
    %13 = vector.load %arg3[%c0_5, %c0_6] : memref<8x64xf32, #tpu.memory_space<vmem>>, vector<8x64xf32>
    %14 = arith.addf %12, %13 : vector<8x64xf32>
    %15 = arith.mulf %11, %14 : vector<8x64xf32>
    %cst = arith.constant dense<0.000000e+00> : vector<8xf32>
    %16 = vector.multi_reduction <add>, %15, %cst [1] : vector<8x64xf32> to vector<8xf32>
    %17 = vector.shape_cast %16 : vector<8xf32> to vector<8x1xf32>
    %cst_7 = arith.constant 0.000000e+00 : f32
    %18 = vector.broadcast %cst_7 : f32 to vector<8x1xf32>
    %19 = arith.minimumf %17, %18 : vector<8x1xf32>
    %20 = math.absf %17 : vector<8x1xf32>
    %cst_8 = arith.constant 0.000000e+00 : f32
    %21 = vector.broadcast %cst_8 : f32 to vector<8x1xf32>
    %22 = arith.subf %21, %20 : vector<8x1xf32>
    %23 = math.exp %22 : vector<8x1xf32>
    %24 = math.log1p %23 : vector<8x1xf32>
    %25 = arith.subf %19, %24 : vector<8x1xf32>
    %26 = arith.addf %11, %13 : vector<8x64xf32>
    %27 = arith.mulf %12, %26 : vector<8x64xf32>
    %cst_9 = arith.constant dense<0.000000e+00> : vector<8xf32>
    %28 = vector.multi_reduction <add>, %27, %cst_9 [1] : vector<8x64xf32> to vector<8xf32>
    %29 = vector.shape_cast %28 : vector<8xf32> to vector<8x1xf32>
    %cst_10 = arith.constant 0.000000e+00 : f32
    %30 = vector.broadcast %cst_10 : f32 to vector<8x1xf32>
    %31 = arith.minimumf %29, %30 : vector<8x1xf32>
    %32 = math.absf %29 : vector<8x1xf32>
    %cst_11 = arith.constant 0.000000e+00 : f32
    %33 = vector.broadcast %cst_11 : f32 to vector<8x1xf32>
    %34 = arith.subf %33, %32 : vector<8x1xf32>
    %35 = math.exp %34 : vector<8x1xf32>
    %36 = math.log1p %35 : vector<8x1xf32>
    %37 = arith.subf %31, %36 : vector<8x1xf32>
    %38 = arith.addf %25, %37 : vector<8x1xf32>
    %39 = arith.addf %11, %12 : vector<8x64xf32>
    %40 = arith.mulf %13, %39 : vector<8x64xf32>
    %cst_12 = arith.constant dense<0.000000e+00> : vector<8xf32>
    %41 = vector.multi_reduction <add>, %40, %cst_12 [1] : vector<8x64xf32> to vector<8xf32>
    %42 = vector.shape_cast %41 : vector<8xf32> to vector<8x1xf32>
    %cst_13 = arith.constant 0.000000e+00 : f32
    %43 = vector.broadcast %cst_13 : f32 to vector<8x1xf32>
    %44 = arith.minimumf %42, %43 : vector<8x1xf32>
    %45 = math.absf %42 : vector<8x1xf32>
    %cst_14 = arith.constant 0.000000e+00 : f32
    %46 = vector.broadcast %cst_14 : f32 to vector<8x1xf32>
    %47 = arith.subf %46, %45 : vector<8x1xf32>
    %48 = math.exp %47 : vector<8x1xf32>
    %49 = math.log1p %48 : vector<8x1xf32>
    %50 = arith.subf %44, %49 : vector<8x1xf32>
    %51 = arith.addf %38, %50 : vector<8x1xf32>
    %c0_15 = arith.constant 0 : index
    %c0_16 = arith.constant 0 : index
    %c0_17 = arith.constant 0 : index
    %52 = vector.load %arg4[%c0_15, %c0_16, %c0_17] : memref<8x3x64xf32, #tpu.memory_space<vmem>>, vector<8x3x64xf32>
    %c0_18 = arith.constant 0 : index
    %c0_19 = arith.constant 0 : index
    %c0_20 = arith.constant 0 : index
    %53 = vector.load %arg5[%c0_18, %c0_19, %c0_20] : memref<8x3x64xf32, #tpu.memory_space<vmem>>, vector<8x3x64xf32>
    %c0_21 = arith.constant 0 : index
    %c0_22 = arith.constant 0 : index
    %c0_23 = arith.constant 0 : index
    %54 = vector.load %arg6[%c0_21, %c0_22, %c0_23] : memref<8x3x64xf32, #tpu.memory_space<vmem>>, vector<8x3x64xf32>
    %55 = vector.shape_cast %11 : vector<8x64xf32> to vector<8x1x64xf32>
    %56 = vector.broadcast %55 : vector<8x1x64xf32> to vector<8x3x64xf32>
    %57 = arith.mulf %52, %56 : vector<8x3x64xf32>
    %cst_24 = arith.constant dense<0.000000e+00> : vector<8x3xf32>
    %58 = vector.multi_reduction <add>, %57, %cst_24 [2] : vector<8x3x64xf32> to vector<8x3xf32>
    %cst_25 = arith.constant 0.000000e+00 : f32
    %59 = vector.broadcast %cst_25 : f32 to vector<8x3xf32>
    %60 = arith.subf %59, %58 : vector<8x3xf32>
    %cst_26 = arith.constant 0.000000e+00 : f32
    %61 = vector.broadcast %cst_26 : f32 to vector<8x3xf32>
    %62 = arith.minimumf %60, %61 : vector<8x3xf32>
    %63 = math.absf %60 : vector<8x3xf32>
    %cst_27 = arith.constant 0.000000e+00 : f32
    %64 = vector.broadcast %cst_27 : f32 to vector<8x3xf32>
    %65 = arith.subf %64, %63 : vector<8x3xf32>
    %66 = math.exp %65 : vector<8x3xf32>
    %67 = math.log1p %66 : vector<8x3xf32>
    %68 = arith.subf %62, %67 : vector<8x3xf32>
    %69 = vector.shape_cast %12 : vector<8x64xf32> to vector<8x1x64xf32>
    %70 = vector.broadcast %69 : vector<8x1x64xf32> to vector<8x3x64xf32>
    %71 = arith.mulf %53, %70 : vector<8x3x64xf32>
    %cst_28 = arith.constant dense<0.000000e+00> : vector<8x3xf32>
    %72 = vector.multi_reduction <add>, %71, %cst_28 [2] : vector<8x3x64xf32> to vector<8x3xf32>
    %cst_29 = arith.constant 0.000000e+00 : f32
    %73 = vector.broadcast %cst_29 : f32 to vector<8x3xf32>
    %74 = arith.subf %73, %72 : vector<8x3xf32>
    %cst_30 = arith.constant 0.000000e+00 : f32
    %75 = vector.broadcast %cst_30 : f32 to vector<8x3xf32>
    %76 = arith.minimumf %74, %75 : vector<8x3xf32>
    %77 = math.absf %74 : vector<8x3xf32>
    %cst_31 = arith.constant 0.000000e+00 : f32
    %78 = vector.broadcast %cst_31 : f32 to vector<8x3xf32>
    %79 = arith.subf %78, %77 : vector<8x3xf32>
    %80 = math.exp %79 : vector<8x3xf32>
    %81 = math.log1p %80 : vector<8x3xf32>
    %82 = arith.subf %76, %81 : vector<8x3xf32>
    %83 = arith.addf %68, %82 : vector<8x3xf32>
    %84 = vector.shape_cast %13 : vector<8x64xf32> to vector<8x1x64xf32>
    %85 = vector.broadcast %84 : vector<8x1x64xf32> to vector<8x3x64xf32>
    %86 = arith.mulf %54, %85 : vector<8x3x64xf32>
    %cst_32 = arith.constant dense<0.000000e+00> : vector<8x3xf32>
    %87 = vector.multi_reduction <add>, %86, %cst_32 [2] : vector<8x3x64xf32> to vector<8x3xf32>
    %cst_33 = arith.constant 0.000000e+00 : f32
    %88 = vector.broadcast %cst_33 : f32 to vector<8x3xf32>
    %89 = arith.subf %88, %87 : vector<8x3xf32>
    %cst_34 = arith.constant 0.000000e+00 : f32
    %90 = vector.broadcast %cst_34 : f32 to vector<8x3xf32>
    %91 = arith.minimumf %89, %90 : vector<8x3xf32>
    %92 = math.absf %89 : vector<8x3xf32>
    %cst_35 = arith.constant 0.000000e+00 : f32
    %93 = vector.broadcast %cst_35 : f32 to vector<8x3xf32>
    %94 = arith.subf %93, %92 : vector<8x3xf32>
    %95 = math.exp %94 : vector<8x3xf32>
    %96 = math.log1p %95 : vector<8x3xf32>
    %97 = arith.subf %91, %96 : vector<8x3xf32>
    %98 = arith.addf %83, %97 : vector<8x3xf32>
    %99 = arith.mulf %10, %51 : vector<8x1xf32>
    %100 = vector.shape_cast %99 : vector<8x1xf32> to vector<1x8x1xf32>
    %cst_36 = arith.constant dense<0.000000e+00> : vector<1xf32>
    %101 = vector.multi_reduction <add>, %100, %cst_36 [1, 2] : vector<1x8x1xf32> to vector<1xf32>
    %102 = vector.shape_cast %101 : vector<1xf32> to vector<1x1x1xf32>
    %103 = vector.extract %102[0, 0, 0] : f32 from vector<1x1x1xf32>
    %104 = vector.broadcast %10 : vector<8x1xf32> to vector<8x3xf32>
    %105 = arith.mulf %104, %98 : vector<8x3xf32>
    %106 = vector.shape_cast %105 : vector<8x3xf32> to vector<1x8x3xf32>
    %cst_37 = arith.constant dense<0.000000e+00> : vector<1xf32>
    %107 = vector.multi_reduction <add>, %106, %cst_37 [1, 2] : vector<1x8x3xf32> to vector<1xf32>
    %108 = vector.shape_cast %107 : vector<1xf32> to vector<1x1x1xf32>
    %109 = vector.extract %108[0, 0, 0] : f32 from vector<1x1x1xf32>
    %110 = arith.addf %103, %109 : f32
    %c0_38 = arith.constant 0 : index
    %c0_39 = arith.constant 0 : index
    %111 = memref.load %arg7[%c0_38, %c0_39] : memref<1x1xf32, #tpu.memory_space<smem>>
    %112 = arith.subf %111, %110 : f32
    %c0_40 = arith.constant 0 : index
    %c0_41 = arith.constant 0 : index
    %113 = memref.load %arg7[%c0_40, %c0_41] : memref<1x1xf32, #tpu.memory_space<smem>>
    memref.store %112, %arg7[%c0_40, %c0_41] : memref<1x1xf32, #tpu.memory_space<smem>>
    return
  }
  func.func @transform_0(%arg0: i32) -> (i32, i32) {
    %c0_i32 = arith.constant 0 : i32
    %c0_i32_0 = arith.constant 0 : i32
    return %arg0, %c0_i32 : i32, i32
  }
  func.func @transform_1(%arg0: i32) -> (i32, i32) {
    %c0_i32 = arith.constant 0 : i32
    %c0_i32_0 = arith.constant 0 : i32
    return %arg0, %c0_i32 : i32, i32
  }
  func.func @transform_2(%arg0: i32) -> (i32, i32) {
    %c0_i32 = arith.constant 0 : i32
    %c0_i32_0 = arith.constant 0 : i32
    return %arg0, %c0_i32 : i32, i32
  }
  func.func @transform_3(%arg0: i32) -> (i32, i32, i32) {
    %c0_i32 = arith.constant 0 : i32
    %c0_i32_0 = arith.constant 0 : i32
    %c0_i32_1 = arith.constant 0 : i32
    return %arg0, %c0_i32, %c0_i32_0 : i32, i32, i32
  }
  func.func @transform_4(%arg0: i32) -> (i32, i32, i32) {
    %c0_i32 = arith.constant 0 : i32
    %c0_i32_0 = arith.constant 0 : i32
    %c0_i32_1 = arith.constant 0 : i32
    return %arg0, %c0_i32, %c0_i32_0 : i32, i32, i32
  }
  func.func @transform_5(%arg0: i32) -> (i32, i32, i32) {
    %c0_i32 = arith.constant 0 : i32
    %c0_i32_0 = arith.constant 0 : i32
    %c0_i32_1 = arith.constant 0 : i32
    return %arg0, %c0_i32, %c0_i32_0 : i32, i32, i32
  }
  func.func @transform_6(%arg0: i32) -> (i32, i32) {
    %c0_i32 = arith.constant 0 : i32
    %c0_i32_0 = arith.constant 0 : i32
    %c0_i32_1 = arith.constant 0 : i32
    return %c0_i32, %c0_i32_0 : i32, i32
  }
}

</mosaic_0001>

<bundles_post_ra>
// kernel: _lambda_.4
= control target key start
LH: loop header
LB: loop body
LE: loop exit
PB: predicated region body
PF: predicated region fallthrough
CT: control target
= control target key end

     0   :  { %vm435_vm0 = vcmask 261120   ;;  %vm444_vm1 = vcmask 523264   ;;  %vm709_vm2 = vcmask 7168   ;;  %s1381_s4 = inlined_call_operand.vmem [shape: bf16[128,64], index: 4, kind: input, shape index: {}]   ;;  %s1382_s0 = inlined_call_operand.vmem [shape: f32[64,128], index: 0, kind: input, shape index: {}]   ;;  %s1383_s1 = inlined_call_operand.vmem [shape: f32[64,128], index: 1, kind: input, shape index: {}]   ;;  %s1384_s5 = inlined_call_operand.vmem [shape: f32[1,64], index: 5, kind: input, shape index: {}]   ;;  %s1385_s3 = inlined_call_operand.vmem [shape: f32[64,32], index: 3, kind: input, shape index: {}]   ;;  %s1386_s2 = inlined_call_operand.vmem [shape: f32[64,32], index: 2, kind: input, shape index: {}]   ;;  %s1387_s6 = inlined_call_operand.vmem [shape: f32[64,64], index: 6, kind: output, shape index: {0}]   ;;  %s1388_s7 = inlined_call_operand.vmem [shape: f32[64,1], index: 7, kind: output, shape index: {1}]  }
   0x1   :  { %v817_v0 = vld [vmem:[%s1381_s4] sm:$0xff]   ;;  %v818_v1 = vld [vmem:[%s1381_s4 + $0x8] sm:$0xff]   ;;  %v819_v2 = vld [vmem:[%s1381_s4 + $0x10] sm:$0xff]  }
   0x2   :  { %767 = vmatprep.subr.bf16.mxu0 %v817_v0  ;;  %791 = vmatprep.subr.bf16.mxu1 %v817_v0  ;;  %v820_v3 = vld [vmem:[%s1381_s4 + $0x18] sm:$0xff]   ;;  %v43_v4 = vld [vmem:[%s1382_s0] sm:$0xff]  ;;  %v44_v5 = vld [vmem:[%s1382_s0 + $0x8] sm:$0xff] }
   0x3   :  { %768 = vmatpush3.bf16.msra.mxu0 %v817_v0  ;;  %792 = vmatpush3.bf16.msra.mxu1 %v817_v0  ;;  %v55_v6 = vld [vmem:[%s1383_s1] sm:$0xff]  ;;  %v51_v7 = vpack.c.bf16 %v44_v5, %v43_v4  ;;  %v56_v8 = vld [vmem:[%s1383_s1 + $0x8] sm:$0xff]  ;;  %v823_v12 = vld [vmem:[%s1381_s4 + $0x30] sm:$0xff]  }
   0x4   :  { %769 = vmatprep.subr.bf16.mxu0 %v818_v1  ;;  %793 = vmatprep.subr.bf16.mxu1 %v818_v1  ;;  %v63_v9 = vpack.c.bf16 %v56_v8, %v55_v6  ;;  %v821_v10 = vld [vmem:[%s1381_s4 + $0x20] sm:$0xff]   ;;  %v822_v11 = vld [vmem:[%s1381_s4 + $0x28] sm:$0xff]   ;;  %v824_v13 = vld [vmem:[%s1381_s4 + $0x38] sm:$0xff]  }
   0x5   :  { %783 = vmatprep.mubr.bf16.mxu0 %v51_v7  ;;  %v45_v14 = vld [vmem:[%s1382_s0 + $0x10] sm:$0xff]  ;;  %v46_v15 = vld [vmem:[%s1382_s0 + $0x18] sm:$0xff]  ;;  %v47_v18 = vld [vmem:[%s1382_s0 + $0x20] sm:$0xff] }
   0x6   :  { %807 = vmatprep.mubr.bf16.mxu1 %v63_v9  ;;  %v57_v16 = vld [vmem:[%s1383_s1 + $0x10] sm:$0xff]  ;;  %v58_v17 = vld [vmem:[%s1383_s1 + $0x18] sm:$0xff]  ;;  %v48_v19 = vld [vmem:[%s1382_s0 + $0x28] sm:$0xff]  ;;  %v52_v22 = vpack.c.bf16 %v46_v15, %v45_v14 }
   0x7   :  { %770 = vmatpush3.bf16.msra.mxu0 %v818_v1  ;;  %794 = vmatpush3.bf16.msra.mxu1 %v818_v1  ;;  %v59_v20 = vld [vmem:[%s1383_s1 + $0x20] sm:$0xff]  ;;  %v60_v21 = vld [vmem:[%s1383_s1 + $0x28] sm:$0xff]  ;;  %v64_v23 = vpack.c.bf16 %v58_v17, %v57_v16  ;;  %v53_v24 = vpack.c.bf16 %v48_v19, %v47_v18  ;;  %v49_v26 = vld [vmem:[%s1382_s0 + $0x30] sm:$0xff] }
   0x8   :  { %771 = vmatprep.subr.bf16.mxu0 %v819_v2  ;;  %795 = vmatprep.subr.bf16.mxu1 %v819_v2  ;;  %v65_v25 = vpack.c.bf16 %v60_v21, %v59_v20  ;;  %v50_v27 = vld [vmem:[%s1382_s0 + $0x38] sm:$0xff]  ;;  %v61_v28 = vld [vmem:[%s1383_s1 + $0x30] sm:$0xff]  ;;  %v726_v32 = vld [vmem:[%s1384_s5] ss:$0 sm:$0xff]  ;;  %s937_s0 = smov 96  }
   0x9   :  { %v62_v29 = vld [vmem:[%s1383_s1 + $0x38] sm:$0xff]  ;;  %v54_v30 = vpack.c.bf16 %v50_v27, %v49_v26  ;;  %s938_s1 = smov 32  }
   0xa   :  { %v66_v31 = vpack.c.bf16 %v62_v29, %v61_v28 }
   0xb   :  { %772 = vmatpush3.bf16.msra.mxu0 %v819_v2  ;;  %796 = vmatpush3.bf16.msra.mxu1 %v819_v2 }
   0xc   :  { %773 = vmatprep.subr.bf16.mxu0 %v820_v3  ;;  %797 = vmatprep.subr.bf16.mxu1 %v820_v3 }
   0xf   :  { %774 = vmatpush3.bf16.msra.mxu0 %v820_v3  ;;  %798 = vmatpush3.bf16.msra.mxu1 %v820_v3 }
  0x10   :  { %775 = vmatprep.subr.bf16.mxu0 %v821_v10  ;;  %799 = vmatprep.subr.bf16.mxu1 %v821_v10 }
  0x13   :  { %776 = vmatpush3.bf16.msra.mxu0 %v821_v10  ;;  %800 = vmatpush3.bf16.msra.mxu1 %v821_v10 }
  0x14   :  { %777 = vmatprep.subr.bf16.mxu0 %v822_v11  ;;  %801 = vmatprep.subr.bf16.mxu1 %v822_v11 }
  0x17   :  { %778 = vmatpush3.bf16.msra.mxu0 %v822_v11  ;;  %802 = vmatpush3.bf16.msra.mxu1 %v822_v11 }
  0x18   :  { %779 = vmatprep.subr.bf16.mxu0 %v823_v12  ;;  %803 = vmatprep.subr.bf16.mxu1 %v823_v12 }
  0x1b   :  { %780 = vmatpush3.bf16.msra.mxu0 %v823_v12  ;;  %804 = vmatpush3.bf16.msra.mxu1 %v823_v12 }
  0x1c   :  { %781 = vmatprep.subr.bf16.mxu0 %v824_v13  ;;  %805 = vmatprep.subr.bf16.mxu1 %v824_v13 }
  0x1f   :  { %782 = vmatpush3.bf16.msra.mxu0 %v824_v13  ;;  %806 = vmatpush3.bf16.msra.mxu1 %v824_v13 }
  0x22   :  { %784 = vmatmul.mubr.bf16.vlgmr.msra.gmra.mrb[0].mxu0 %v52_v22  ;;  %808 = vmatmul.mubr.bf16.vlgmr.msra.gmra.mrb[0].mxu1 %v64_v23 }
  0x23   :  { %787 = vmatprep.mubr.bf16.mxu0 %v53_v24  ;;  %811 = vmatprep.mubr.bf16.mxu1 %v65_v25 }
  0x2a   :  { %788 = vmatmul.mubr.bf16.gmra.mrb[4].mxu0 %v54_v30  ;;  %812 = vmatmul.mubr.bf16.gmra.mrb[4].mxu1 %v66_v31 }
  0xf5   :  { %v785_v33 = vpop.f32.mrb[0].mxu0  ;;  %v809_v34 = vpop.f32.mrb[0].mxu1 }
  0xf6   :  { %v164_v35 = vadd.f32 %v785_v33, %v726_v32  ;;  %v237_v36 = vadd.f32 %v809_v34, %v726_v32  ;;  %v155_v37 = vpop.f32.mrb[1].mxu0  ;;  %v228_v38 = vpop.f32.mrb[1].mxu1 }
  0xf7   :  { %v156_v39 = vadd.f32 %v726_v32, %v155_v37  ;;  %v229_v40 = vadd.f32 %v726_v32, %v228_v38  ;;  %v786_v41 = vpop.f32.mrb[2].mxu0  ;;  %v810_v42 = vpop.f32.mrb[2].mxu1 }
  0xf8   :  { %v167_v43 = vadd.f32 %v786_v41, %v726_v32  ;;  %v158_v44 = vpop.f32.mrb[3].mxu0  ;;  %v231_v45 = vpop.f32.mrb[3].mxu1  ;;  %825 = vtanh.f32 %v237_v36  ;;  %v240_v46 = vadd.f32 %v810_v42, %v726_v32 }
  0xf9   :  { %v159_v47 = vadd.f32 %v726_v32, %v158_v44  ;;  %827 = vtanh.f32 %v164_v35  ;;  %v232_v48 = vadd.f32 %v726_v32, %v231_v45 }
  0xfa   :  { %829 = vtanh.f32 %v229_v40 }
  0xfb   :  { %831 = vtanh.f32 %v156_v39 }
  0xfc   :  { %833 = vtanh.f32 %v240_v46 }
  0xfd   :  { %v789_v49 = vpop.f32.mrb[4].mxu0  ;;  %v813_v50 = vpop.f32.mrb[4].mxu1  ;;  %835 = vtanh.f32 %v167_v43 }
  0xfe   :  { %v180_v51 = vadd.f32 %v789_v49, %v726_v32  ;;  %v253_v52 = vadd.f32 %v813_v50, %v726_v32  ;;  %v171_v53 = vpop.f32.mrb[5].mxu0  ;;  %v244_v54 = vpop.f32.mrb[5].mxu1  ;;  %837 = vtanh.f32 %v232_v48 }
  0xff   :  { %v172_v55 = vadd.f32 %v726_v32, %v171_v53  ;;  %v245_v56 = vadd.f32 %v726_v32, %v244_v54  ;;  %v790_v57 = vpop.f32.mrb[6].mxu0  ;;  %v814_v58 = vpop.f32.mrb[6].mxu1  ;;  %839 = vtanh.f32 %v159_v47 }
 0x100   :  { %v1054_v59 = vadd.f32 %v790_v57, %v726_v32  ;;  %v174_v60 = vpop.f32.mrb[7].mxu0  ;;  %v247_v61 = vpop.f32.mrb[7].mxu1  ;;  %841 = vtanh.f32 %v253_v52  ;;  %v256_v62 = vadd.f32 %v814_v58, %v726_v32 }
 0x101   :  { %v1056_v63 = vadd.f32 %v726_v32, %v174_v60  ;;  %843 = vtanh.f32 %v172_v55  ;;  %v248_v1 = vadd.f32 %v726_v32, %v247_v61 }
 0x102   :  { %v1058_v0 = vpop.eup %825  ;;  %845 = vtanh.f32 %v245_v56 }
 0x103   :  { %v1060_v2 = vpop.eup %827  ;;  %v293_v3 = vmul.f32 0.5, %v1058_v0  ;;  %847 = vtanh.f32 %v256_v62 }
 0x104   :  { %v1063_v4 = vpop.eup %829  ;;  %v269_v5 = vmul.f32 0.5, %v1060_v2  ;;  %849 = vtanh.f32 %v248_v1 }
 0x105   :  { %v1066_v6 = vpop.eup %831  ;;  %v303_v7 = vmul.f32 1.442695, %v293_v3  ;;  %v291_v8 = vmul.f32 0.5, %v1063_v4 }
 0x106   :  { %v1069_v9 = vpop.eup %833  ;;  %v267_v10 = vmul.f32 0.5, %v1066_v6  ;;  %v279_v15 = vmul.f32 1.442695, %v269_v5 }
 0x107   :  { %v1072_v11 = vpop.eup %835  ;;  %v294_v12 = vmul.f32 0.5, %v1069_v9  ;;  %851 = vpow2.f32 %v303_v7  ;;  %v299_v13 = vmul.f32 1.442695, %v291_v8 }
 0x108   :  { %v1075_v14 = vpop.eup %837  ;;  %v270_v16 = vmul.f32 0.5, %v1072_v11  ;;  %v275_v21 = vmul.f32 1.442695, %v267_v10 }
 0x109   :  { %v1078_v17 = vpop.eup %839  ;;  %v305_v18 = vmul.f32 1.442695, %v294_v12  ;;  %v292_v19 = vmul.f32 0.5, %v1075_v14  ;;  %853 = vpow2.f32 %v299_v13 }
 0x10a   :  { %v1081_v20 = vpop.eup %841  ;;  %855 = vtanh.f32 %v180_v51  ;;  %v268_v22 = vmul.f32 0.5, %v1078_v17  ;;  %v281_v27 = vmul.f32 1.442695, %v270_v16 }
 0x10b   :  { %v1084_v23 = vpop.eup %843  ;;  %857 = vpow2.f32 %v305_v18  ;;  %v301_v24 = vmul.f32 1.442695, %v292_v19  ;;  %v297_v25 = vmul.f32 0.5, %v1081_v20 }
 0x10c   :  { %v1087_v26 = vpop.eup %845  ;;  %859 = vpow2.f32 %v279_v15  ;;  %v271_v28 = vmul.f32 0.5, %v1084_v23  ;;  %v277_v32 = vmul.f32 1.442695, %v268_v22 }
 0x10d   :  { %861 = vpow2.f32 %v301_v24  ;;  %v311_v29 = vmul.f32 1.442695, %v297_v25  ;;  %v295_v30 = vmul.f32 0.5, %v1087_v26  ;;  %v1091_v31 = vpop.eup %847 }
 0x10e   :  { %863 = vpow2.f32 %v275_v21  ;;  %v298_v34 = vmul.f32 0.5, %v1091_v31  ;;  %v1094_v35 = vpop.eup %849  ;;  %v283_v36 = vmul.f32 1.442695, %v271_v28 }
 0x10f   :  { %865 = vpow2.f32 %v311_v29  ;;  %v307_v33 = vmul.f32 1.442695, %v295_v30  ;;  %v296_v39 = vmul.f32 0.5, %v1094_v35 }
 0x110   :  { %867 = vpow2.f32 %v281_v27  ;;  %v313_v38 = vmul.f32 1.442695, %v298_v34 }
 0x111   :  { %v1096_v37 = vpop.eup %851  ;;  %869 = vpow2.f32 %v307_v33  ;;  %v309_v42 = vmul.f32 1.442695, %v296_v39 }
 0x112   :  { %v471_v40 = vmul.f32 %v1096_v37, %v1096_v37  ;;  %871 = vpow2.f32 %v277_v32 }
 0x113   :  { %v1101_v41 = vpop.eup %853  ;;  %873 = vpow2.f32 %v313_v38 }
 0x114   :  { %v1103_v43 = vpop.eup %855  ;;  %v479_v44 = vadd.f32 1e-10, %v471_v40  ;;  %v469_v45 = vmul.f32 %v1101_v41, %v1101_v41  ;;  %875 = vpow2.f32 %v283_v36 }
 0x115   :  { %v1107_v46 = vpop.eup %857  ;;  %877 = vpow2.f32 %v309_v42  ;;  %v273_v28 = vmul.f32 0.5, %v1103_v43 }
 0x116   :  { %v860_v47 = vpop.eup %859  ;;  %879 = vrcp.f32 %v479_v44  ;;  %v477_v48 = vadd.f32 1e-10, %v469_v45  ;;  %v472_v49 = vmul.f32 %v1107_v46, %v1107_v46 }
 0x117   :  { %v1111_v50 = vpop.eup %861  ;;  %881 = vtanh.f32 %v1056_v63  ;;  %v455_v55 = vmul.f32 %v860_v47, %v860_v47  ;;  %v287_v47 = vmul.f32 1.442695, %v273_v28 }
 0x118   :  { %v864_v51 = vpop.eup %863  ;;  %883 = vrcp.f32 %v477_v48  ;;  %v480_v52 = vadd.f32 1e-10, %v472_v49  ;;  %v470_v53 = vmul.f32 %v1111_v50, %v1111_v50 }
 0x119   :  { %v1116_v54 = vpop.eup %865  ;;  %885 = vtanh.f32 %v1054_v59  ;;  %v453_v61 = vmul.f32 %v864_v51, %v864_v51  ;;  %v463_v3 = vadd.f32 1e-10, %v455_v55 }
 0x11a   :  { %v868_v56 = vpop.eup %867  ;;  %887 = vrcp.f32 %v480_v52  ;;  %v478_v57 = vadd.f32 1e-10, %v470_v53  ;;  %v475_v60 = vmul.f32 %v1116_v54, %v1116_v54 }
 0x11b   :  { %v1119_v58 = vpop.eup %869  ;;  %v456_v5 = vmul.f32 %v868_v56, %v868_v56  ;;  %v461_v12 = vadd.f32 1e-10, %v453_v61 }
 0x11c   :  { %v872_v62 = vpop.eup %871  ;;  %889 = vrcp.f32 %v478_v57  ;;  %v473_v63 = vmul.f32 %v1119_v58, %v1119_v58  ;;  %v483_v10 = vadd.f32 1e-10, %v475_v60 }
 0x11d   :  { %v1125_v1 = vpop.eup %873  ;;  %v454_v13 = vmul.f32 %v872_v62, %v872_v62  ;;  %v464_v22 = vadd.f32 1e-10, %v456_v5 }
 0x11e   :  { %v876_v59 = vpop.eup %875  ;;  %v481_v7 = vadd.f32 1e-10, %v473_v63  ;;  %v476_v18 = vmul.f32 %v1125_v1, %v1125_v1 }
 0x11f   :  { %v1127_v8 = vpop.eup %877  ;;  %v462_v32 = vadd.f32 1e-10, %v454_v13  ;;  %v457_v33 = vmul.f32 %v876_v59, %v876_v59  ;;  %v511_v13 = vsub.f32 %v1058_v0, %v1060_v2  ;;  %v510_v2 = vsub.f32 %v1075_v14, %v1078_v17 }
 0x120   :  { %v880_v15 = vpop.eup %879  ;;  %891 = vrcp.f32 %v481_v7  ;;  %v474_v16 = vmul.f32 %v1127_v8, %v1127_v8  ;;  %v484_v36 = vadd.f32 1e-10, %v476_v18  ;;  %v512_v18 = vsub.f32 %v1069_v9, %v1072_v11 }
 0x121   :  { %v1133_v19 = vpop.eup %881  ;;  %577 = vrot.lane.b32.xlu1 %v880_v15, %s937_s0  ;;  %v1136_v21 = vmul.f32 %v880_v15, %v463_v3  ;;  %893 = vrcp.f32 %v483_v10  ;;  %v465_v45 = vadd.f32 1e-10, %v457_v33  ;;  %v559_v15 = vmul.f32 %v511_v13, %v511_v13 }
 0x122   :  { %v884_v24 = vpop.eup %883  ;;  %v482_v25 = vadd.f32 1e-10, %v474_v16  ;;  %v272_v27 = vmul.f32 0.5, %v1133_v19  ;;  %v509_v16 = vsub.f32 %v1063_v4, %v1066_v6  ;;  %v513_v6 = vsub.f32 %v1087_v26, %v1084_v23 }
 0x123   :  { %v1140_v29 = vpop.eup %885  ;;  %573 = vrot.lane.b32.xlu0 %v884_v24, %s937_s0  ;;  %v1143_v30 = vmul.f32 %v884_v24, %v461_v12  ;;  %v323_v11 = vmul.f32 0.5, %v1101_v41  ;;  %v515_v17 = vsub.f32 %v1081_v20, %v1103_v43  ;;  %v514_v23 = vsub.f32 %v1094_v35, %v1133_v19 }
 0x124   :  { %v888_v34 = vpop.eup %887  ;;  %895 = vrcp.f32 %v482_v25  ;;  %v274_v38 = vmul.f32 0.5, %v1140_v29  ;;  %v285_v42 = vmul.f32 1.442695, %v272_v27  ;;  %v324_v27 = vmul.f32 0.5, %v1111_v50 }
 0x125   :  { %579 = vrot.lane.b32.xlu1 %v888_v34, %s937_s0  ;;  %v1147_v39 = vmul.f32 %v888_v34, %v464_v22  ;;  %897 = vrcp.f32 %v484_v36  ;;  %v557_v28 = vmul.f32 %v509_v16, %v509_v16  ;;  %v327_v50 = vmul.f32 0.5, %v1119_v58 }
 0x126   :  { %v890_v40 = vpop.eup %889  ;;  %v289_v48 = vmul.f32 1.442695, %v274_v38  ;;  %899 = vpow2.f32 %v285_v42  ;;  %v558_v42 = vmul.f32 %v510_v2, %v510_v2  ;;  %v325_v41 = vmul.f32 0.5, %v1096_v37 }
 0x127   :  { %575 = vrot.lane.b32.xlu0 %v890_v40, %s937_s0  ;;  %v1150_v44 = vmul.f32 %v890_v40, %v462_v32  ;;  %901 = vpow2.f32 %v287_v47  ;;  %v560_v32 = vmul.f32 %v512_v18, %v512_v18  ;;  %v333_v40 = vmul.f32 1.442695, %v324_v27 }
 0x128   :  { %903 = vpow2.f32 %v289_v48  ;;  %v331_v48 = vmul.f32 1.442695, %v323_v11  ;;  %v329_v58 = vmul.f32 0.5, %v1116_v54  ;;  %v516_v43 = vsub.f32 %v1091_v31, %v1140_v29 }
 0x129   :  { %905 = vpow2.f32 %v333_v40  ;;  %v335_v19 = vmul.f32 1.442695, %v325_v41  ;;  %v328_v29 = vmul.f32 0.5, %v1127_v8 }
 0x12a   :  { %v892_v49 = vpop.eup %891  ;;  %907 = vpow2.f32 %v331_v48  ;;  %v343_v37 = vmul.f32 1.442695, %v329_v58 }
 0x12b   :  { %581 = vrot.lane.b32.xlu0 %v892_v49, %s937_s0  ;;  %v1153_v51 = vmul.f32 %v892_v49, %v465_v45  ;;  %v894_v52 = vpop.eup %893  ;;  %v561_v45 = vmul.f32 %v513_v6, %v513_v6 }
 0x12e   :  { %v896_v53 = vpop.eup %895 }
 0x12f   :  { %583 = vrot.lane.b32.xlu1 %v896_v53, %s937_s0  ;;  %585 = vrot.lane.b32.xlu0 %v894_v52, %s937_s0  ;;  %v898_v55 = vpop.eup %897 }
 0x130   :  { %v900_v56 = vpop.eup %899 }
 0x131   :  { %v902_v57 = vpop.eup %901  ;;  %v458_v60 = vmul.f32 %v900_v56, %v900_v56  ;;  %v562_v56 = vmul.f32 %v514_v23, %v514_v23 }
 0x132   :  { %v904_v61 = vpop.eup %903  ;;  %v459_v62 = vmul.f32 %v902_v57, %v902_v57 }
 0x133   :  { %587 = vrot.lane.b32.xlu1 %v898_v55, %s937_s0  ;;  %v466_v63 = vadd.f32 1e-10, %v458_v60  ;;  %v460_v3 = vmul.f32 %v904_v61, %v904_v61  ;;  %v326_v61 = vmul.f32 0.5, %v1107_v46  ;;  %v906_v13 = vpop.eup %905  ;;  %v341_v46 = vmul.f32 1.442695, %v328_v29 }
 0x134   :  { %v467_v5 = vadd.f32 1e-10, %v459_v62  ;;  %v908_v16 = vpop.eup %907 }
 0x135   :  { %v1158_v59 = vmul.f32 %v896_v53, %v466_v63  ;;  %v468_v7 = vadd.f32 1e-10, %v460_v3  ;;  %v564_v63 = vmul.f32 %v516_v43, %v516_v43 }
 0x136   :  { %v1160_v10 = vmul.f32 %v894_v52, %v467_v5  ;;  %v339_v52 = vmul.f32 1.442695, %v327_v50  ;;  %v337_v5 = vmul.f32 1.442695, %v326_v61 }
 0x137   :  { %v1162_v12 = vmul.f32 %v898_v55, %v468_v7  ;;  %v563_v55 = vmul.f32 %v515_v17, %v515_v17 }
 0x138   :  { %909 = vpow2.f32 %v339_v52 }
 0x139   :  { %911 = vpow2.f32 %v335_v19 }
 0x13a   :  { %913 = vpow2.f32 %v343_v37 }
 0x13b   :  { %915 = vpow2.f32 %v337_v5 }
 0x13c   :  { %917 = vpow2.f32 %v341_v46 }
 0x142   :  { %v910_v18 = vpop.eup %909 }
 0x193   :  { %v578_v22 = vpop.permute.xlu1 %577 }
 0x194   :  { %v599_v24 = vmul.f32 %v578_v22, %v559_v15  ;;  %v330_v15 = vmul.f32 0.5, %v1125_v1 }
 0x195   :  { %v574_v25 = vpop.permute.xlu0 %573 }
 0x196   :  { %617 = vrot.lane.b32.xlu0 %v599_v24, %s938_s1  ;;  %v597_v34 = vmul.f32 %v574_v25, %v557_v28  ;;  %v345_v22 = vmul.f32 1.442695, %v330_v15  ;;  %v912_v24 = vpop.eup %911  ;;  %v395_v25 = vld [vmem:[%s1385_s3] sm:$0xff] }
 0x197   :  { %v580_v33 = vpop.permute.xlu1 %579  ;;  %v914_v8 = vpop.eup %913 }
 0x198   :  { %v600_v36 = vmul.f32 %v580_v33, %v560_v32  ;;  %919 = vpow2.f32 %v345_v22  ;;  %v916_v1 = vpop.eup %915 }
 0x199   :  { %v576_v38 = vpop.permute.xlu0 %575  ;;  %v918_v27 = vpop.eup %917  ;;  %921 = vlog2.f32 %v1136_v21 }
 0x19a   :  { %619 = vrot.lane.b32.xlu1 %v600_v36, %s938_s1  ;;  %613 = vrot.lane.b32.xlu0 %v597_v34, %s938_s1  ;;  %v598_v47 = vmul.f32 %v576_v38, %v558_v42  ;;  %923 = vlog2.f32 %v1147_v39 }
 0x19b   :  { %925 = vlog2.f32 %v1143_v30 }
 0x19c   :  { %927 = vlog2.f32 %v1150_v44 }
 0x19d   :  { %v582_v49 = vpop.permute.xlu0 %581  ;;  %929 = vlog2.f32 %v1160_v10 }
 0x19e   :  { %v601_v53 = vmul.f32 %v582_v49, %v561_v45  ;;  %615 = vrot.lane.b32.xlu1 %v598_v47, %s938_s1  ;;  %931 = vlog2.f32 %v1153_v51 }
 0x19f   :  { %933 = vlog2.f32 %v1162_v12 }
 0x1a0   :  { %621 = vrot.lane.b32.xlu0 %v601_v53, %s938_s1  ;;  %935 = vlog2.f32 %v1158_v59 }
 0x1a1   :  { %v584_v57 = vpop.permute.xlu1 %583  ;;  %v586_v60 = vpop.permute.xlu0 %585 }
 0x1a2   :  { %v602_v62 = vmul.f32 %v584_v57, %v562_v56  ;;  %v603_v54 = vmul.f32 %v586_v60, %v563_v55  ;;  %v920_v28 = vpop.eup %919 }
 0x1a3   :  { %v922_v32 = vpop.eup %921 }
 0x1a4   :  { %623 = vrot.lane.b32.xlu1 %v602_v62, %s938_s1  ;;  %625 = vrot.lane.b32.xlu0 %v603_v54, %s938_s1  ;;  %v924_v2 = vpop.eup %923  ;;  %v522_v33 = vmul.f32 0.6931472, %v922_v32 }
 0x1a5   :  { %v588_v3 = vpop.permute.xlu1 %587  ;;  %v926_v6 = vpop.eup %925  ;;  %v524_v11 = vmul.f32 0.6931472, %v924_v2 }
 0x1a6   :  { %v604_v7 = vmul.f32 %v588_v3, %v564_v63  ;;  %v928_v34 = vpop.eup %927  ;;  %v535_v36 = vsub.f32 0.0, %v522_v33  ;;  %v518_v38 = vmul.f32 0.6931472, %v926_v6  ;;  %v316_v33 = vld [vmem:[%s1386_s2 + $0x8] sm:$0xff] }
 0x1a7   :  { %v520_v40 = vmul.f32 0.6931472, %v928_v34  ;;  %v536_v42 = vsub.f32 0.0, %v524_v11  ;;  %v930_v17 = vpop.eup %929 }
 0x1a8   :  { %627 = vrot.lane.b32.xlu1 %v604_v7, %s938_s1  ;;  %357 = vrot.lane.b32.xlu0 %v906_v13, %s937_s0  ;;  %v737_v50 = vadd.f32 -1.0, %v535_v36  ;;  %v533_v45 = vsub.f32 0.0, %v518_v38  ;;  %v932_v49 = vpop.eup %931  ;;  %v530_v53 = vmul.f32 0.6931472, %v930_v17 }
 0x1a9   :  { %v534_v47 = vsub.f32 0.0, %v520_v40  ;;  %v738_v48 = vadd.f32 -1.0, %v536_v42  ;;  %v934_v55 = vpop.eup %933  ;;  %v526_v60 = vmul.f32 0.6931472, %v932_v49 }
 0x1aa   :  { %v551_v23 = vadd.f32 %v737_v50, %v1136_v21  ;;  %v735_v41 = vadd.f32 -1.0, %v533_v45  ;;  %v936_v37 = vpop.eup %935  ;;  %v539_v21 = vsub.f32 0.0, %v530_v53  ;;  %v532_v3 = vmul.f32 0.6931472, %v934_v55  ;;  %v396_v55 = vld [vmem:[%s1385_s3 + $0x8] sm:$0xff] }
 0x1ab   :  { %v736_v56 = vadd.f32 -1.0, %v534_v47  ;;  %v552_v19 = vadd.f32 %v738_v48, %v1147_v39  ;;  %v537_v13 = vsub.f32 0.0, %v526_v60  ;;  %v528_v46 = vmul.f32 0.6931472, %v936_v37  ;;  %v321_v48 = vld [vmem:[%s1386_s2 + $0x30] sm:$0xff]  ;;  %v398_v60 = vld [vmem:[%s1385_s3 + $0x18] sm:$0xff] }
 0x1ac   :  { %355 = vrot.lane.b32.xlu1 %v908_v16, %s937_s0  ;;  %363 = vrot.lane.b32.xlu0 %v910_v18, %s937_s0  ;;  %v549_v57 = vadd.f32 %v735_v41, %v1143_v30  ;;  %v741_v30 = vadd.f32 -1.0, %v539_v21  ;;  %v540_v16 = vsub.f32 0.0, %v532_v3  ;;  %v397_v41 = vld [vmem:[%s1385_s3 + $0x10] sm:$0xff] }
 0x1ad   :  { %v550_v5 = vadd.f32 %v736_v56, %v1150_v44  ;;  %v399_v56 = vld [vmem:[%s1385_s3 + $0x20] sm:$0xff] }
 0x1ae   :  { %v555_v44 = vadd.f32 %v741_v30, %v1160_v10 }
 0x1b0   :  { %359 = vrot.lane.b32.xlu1 %v912_v24, %s937_s0  ;;  %367 = vrot.lane.b32.xlu0 %v914_v8, %s937_s0  ;;  %v739_v24 = vadd.f32 -1.0, %v537_v13  ;;  %v538_v8 = vsub.f32 0.0, %v528_v46 }
 0x1b2   :  { %v740_v32 = vadd.f32 -1.0, %v538_v8 }
 0x1b4   :  { %361 = vrot.lane.b32.xlu1 %v916_v1, %s937_s0  ;;  %411 = vrot.lane.b32.xlu0 %v395_v25, %s938_s1  ;;  %v742_v25 = vadd.f32 -1.0, %v540_v16  ;;  %v554_v40 = vadd.f32 %v740_v32, %v1158_v59 }
 0x1b6   :  { %v556_v36 = vadd.f32 %v742_v25, %v1162_v12  ;;  %v315_v12 = vld [vmem:[%s1386_s2] sm:$0xff]  ;;  %v318_v25 = vld [vmem:[%s1386_s2 + $0x18] sm:$0xff] }
 0x1b8   :  { %365 = vrot.lane.b32.xlu1 %v918_v27, %s937_s0 }
 0x1bc   :  { %369 = vrot.lane.b32.xlu1 %v920_v28, %s937_s0  ;;  %v553_v28 = vadd.f32 %v739_v24, %v1153_v51  ;;  %v319_v51 = vld [vmem:[%s1386_s2 + $0x20] sm:$0xff] }
 0x208   :  { %v618_v52 = vpop.permute.xlu0 %617 }
 0x209   :  { %v639_v58 = vadd.f32 %v618_v52, %v551_v23 }
 0x20b   :  { %v647_v43 = vmul.f32 0.5, %v639_v58 }
 0x20c   :  { %v620_v61 = vpop.permute.xlu1 %619  ;;  %v614_v62 = vpop.permute.xlu0 %613 }
 0x20d   :  { %v640_v54 = vadd.f32 %v620_v61, %v552_v19  ;;  %v637_v63 = vadd.f32 %v614_v62, %v549_v57  ;;  %665 = vrot.lane.b32.xlu0 %v647_v43, %s937_s0 }
 0x20f   :  { %v648_v29 = vmul.f32 0.5, %v640_v54  ;;  %v645_v7 = vmul.f32 0.5, %v637_v63 }
 0x210   :  { %v616_v15 = vpop.permute.xlu1 %615 }
 0x211   :  { %v638_v39 = vadd.f32 %v616_v15, %v550_v5  ;;  %667 = vrot.lane.b32.xlu1 %v648_v29, %s937_s0  ;;  %661 = vrot.lane.b32.xlu0 %v645_v7, %s937_s0  ;;  %v317_v15 = vld [vmem:[%s1386_s2 + $0x10] sm:$0xff] }
 0x212   :  { %v622_v18 = vpop.permute.xlu0 %621 }
 0x213   :  { %v646_v22 = vmul.f32 0.5, %v638_v39  ;;  %v641_v6 = vadd.f32 %v622_v18, %v553_v28 }
 0x215   :  { %663 = vrot.lane.b32.xlu1 %v646_v22, %s937_s0  ;;  %v649_v42 = vmul.f32 0.5, %v641_v6  ;;  %v320_v6 = vld [vmem:[%s1386_s2 + $0x28] sm:$0xff] }
 0x216   :  { %v624_v1 = vpop.permute.xlu1 %623  ;;  %v626_v27 = vpop.permute.xlu0 %625 }
 0x217   :  { %v643_v2 = vadd.f32 %v626_v27, %v555_v44  ;;  %v642_v45 = vadd.f32 %v624_v1, %v554_v40 }
 0x219   :  { %v651_v34 = vmul.f32 0.5, %v643_v2  ;;  %v650_v49 = vmul.f32 0.5, %v642_v45 }
 0x21a   :  { %v628_v11 = vpop.permute.xlu1 %627  ;;  %v358_v38 = vpop.permute.xlu0 %357 }
 0x21b   :  { %v644_v10 = vadd.f32 %v628_v11, %v556_v36  ;;  %v1231_v50 = vmul.f32 %v358_v38, %v316_v33  ;;  %673 = vrot.lane.b32.xlu0 %v651_v34, %s937_s0 }
 0x21d   :  { %v652_v17 = vmul.f32 0.5, %v644_v10  ;;  %v388_v2 = vadd.f32 %v1075_v14, %v1231_v50 }
 0x21e   :  { %v356_v47 = vpop.permute.xlu1 %355  ;;  %v364_v23 = vpop.permute.xlu0 %363 }
 0x21f   :  { %675 = vrot.lane.b32.xlu1 %v652_v17, %s937_s0  ;;  %v383_v59 = vmul.f32 %v364_v23, %v319_v51  ;;  %669 = vrot.lane.b32.xlu0 %v649_v42, %s937_s0  ;;  %v379_v52 = vmul.f32 %v356_v47, %v315_v12  ;;  %v402_v42 = vld [vmem:[%s1385_s3 + $0x38] sm:$0xff] }
 0x220   :  { %v322_v23 = vld [vmem:[%s1386_s2 + $0x38] sm:$0xff] }
 0x221   :  { %v387_v43 = vadd.f32 %v1063_v4, %v379_v52  ;;  %v400_v4 = vld [vmem:[%s1385_s3 + $0x28] sm:$0xff] }
 0x222   :  { %v368_v58 = vpop.permute.xlu0 %367  ;;  %v360_v37 = vpop.permute.xlu1 %359 }
 0x223   :  { %671 = vrot.lane.b32.xlu1 %v650_v49, %s937_s0  ;;  %v1249_v53 = vmul.f32 %v368_v58, %v321_v48  ;;  %415 = vrot.lane.b32.xlu0 %v397_v41, %s938_s1  ;;  %v381_v16 = vmul.f32 %v360_v37, %v317_v15 }
 0x225   :  { %v389_v44 = vadd.f32 %v1058_v0, %v381_v16  ;;  %v391_v0 = vadd.f32 %v1087_v26, %v383_v59 }
 0x226   :  { %v412_v19 = vpop.permute.xlu0 %411  ;;  %v362_v61 = vpop.permute.xlu1 %361 }
 0x227   :  { %413 = vrot.lane.b32.xlu1 %v396_v55, %s938_s1  ;;  %v436_v57 = vsel %vm435_vm0, %v387_v43, %v412_v19  ;;  %419 = vrot.lane.b32.xlu0 %v399_v56, %s938_s1  ;;  %v382_v33 = vmul.f32 %v362_v61, %v318_v25  ;;  %v393_v43 = vadd.f32 %v1081_v20, %v1249_v53 }
 0x228   :  { %445 = vst.msk [vmem:[%s1387_s6] sm:$0xff] %vm444_vm1, %v436_v57 }
 0x229   :  { %v390_v14 = vadd.f32 %v1069_v9, %v382_v33  ;;  %v401_v9 = vld [vmem:[%s1385_s3 + $0x30] sm:$0xff] }
 0x22a   :  { %v366_v62 = vpop.permute.xlu1 %365 }
 0x22b   :  { %417 = vrot.lane.b32.xlu1 %v398_v60, %s938_s1  ;;  %v384_v26 = vmul.f32 %v366_v62, %v320_v6 }
 0x22d   :  { %v392_v50 = vadd.f32 %v1094_v35, %v384_v26 }
 0x22e   :  { %v1274_v54 = vpop.permute.xlu1 %369 }
 0x22f   :  { %421 = vrot.lane.b32.xlu1 %v400_v4, %s938_s1  ;;  %v386_v48 = vmul.f32 %v1274_v54, %v322_v23 }
 0x231   :  { %v394_v52 = vadd.f32 %v1091_v31, %v386_v48 }
 0x27f   :  { %v666_v63 = vpop.permute.xlu0 %665 }
 0x280   :  { %v691_v21 = vsel %vm435_vm0, %v666_v63, 0.0 }
 0x281   :  { %692 = vadd.xlane.f32.xlu0 %v691_v21 }
 0x283   :  { %v668_v3 = vpop.permute.xlu1 %667  ;;  %v662_v5 = vpop.permute.xlu0 %661 }
 0x284   :  { %v685_v29 = vsel %vm435_vm0, %v662_v5, 0.0  ;;  %v694_v46 = vsel %vm435_vm0, %v668_v3, 0.0 }
 0x285   :  { %686 = vadd.xlane.f32.xlu0 %v685_v29 }
 0x287   :  { %v664_v7 = vpop.permute.xlu1 %663 }
 0x288   :  { %v688_v13 = vsel %vm435_vm0, %v664_v7, 0.0 }
 0x289   :  { %689 = vadd.xlane.f32.xlu1 %v688_v13  ;;  %695 = vadd.xlane.f32.xlu0 %v694_v46 }
 0x28d   :  { %v674_v39 = vpop.permute.xlu0 %673 }
 0x28e   :  { %v703_v30 = vsel %vm435_vm0, %v674_v39, 0.0 }
 0x28f   :  { %704 = vadd.xlane.f32.xlu1 %v703_v30 }
 0x291   :  { %v676_v18 = vpop.permute.xlu1 %675  ;;  %v670_v22 = vpop.permute.xlu0 %669 }
 0x292   :  { %v706_v24 = vsel %vm435_vm0, %v676_v18, 0.0  ;;  %v697_v8 = vsel %vm435_vm0, %v670_v22, 0.0 }
 0x293   :  { %707 = vadd.xlane.f32.xlu0 %v706_v24  ;;  %698 = vadd.xlane.f32.xlu1 %v697_v8 }
 0x295   :  { %v672_v1 = vpop.permute.xlu1 %671  ;;  %v416_v27 = vpop.permute.xlu0 %415 }
 0x296   :  { %v438_v28 = vsel %vm435_vm0, %v389_v44, %v416_v27  ;;  %v700_v32 = vsel %vm435_vm0, %v672_v1, 0.0 }
 0x297   :  { %447 = vst.msk [vmem:[%s1387_s6 + $0x10] sm:$0xff] %vm444_vm1, %v438_v28  ;;  %701 = vadd.xlane.f32.xlu0 %v700_v32 }
 0x299   :  { %v414_v34 = vpop.permute.xlu1 %413  ;;  %v420_v36 = vpop.permute.xlu0 %419 }
 0x29a   :  { %v437_v11 = vsel %vm435_vm0, %v388_v2, %v414_v34  ;;  %v440_v38 = vsel %vm435_vm0, %v391_v0, %v420_v36 }
 0x29b   :  { %446 = vst.msk [vmem:[%s1387_s6 + $0x8] sm:$0xff] %vm444_vm1, %v437_v11  ;;  %449 = vst.msk [vmem:[%s1387_s6 + $0x20] sm:$0xff] %vm444_vm1, %v440_v38 }
 0x29d   :  { %v418_v40 = vpop.permute.xlu1 %417 }
 0x29e   :  { %v439_v10 = vsel %vm435_vm0, %v390_v14, %v418_v40 }
 0x29f   :  { %448 = vst.msk [vmem:[%s1387_s6 + $0x18] sm:$0xff] %vm444_vm1, %v439_v10 }
 0x2a1   :  { %v422_v51 = vpop.permute.xlu1 %421 }
 0x2a2   :  { %v441_v45 = vsel %vm435_vm0, %v392_v50, %v422_v51 }
 0x2a3   :  { %450 = vst.msk [vmem:[%s1387_s6 + $0x28] sm:$0xff] %vm444_vm1, %v441_v45 }
 0x2a4   :  { %425 = vrot.lane.b32.xlu1 %v402_v42, %s938_s1 }
 0x2ad   :  { %423 = vrot.lane.b32.xlu0 %v401_v9, %s938_s1 }
 0x30e   :  { %v693_v35 = vpop.xlane.xlu0 %692 }
 0x30f   :  { %712 = vst.msk [vmem:[%s1388_s7 + $0x10] sm:$0xff] %vm709_vm2, %v693_v35 }
 0x312   :  { %v687_v17 = vpop.xlane.xlu0 %686 }
 0x313   :  { %710 = vst.msk [vmem:[%s1388_s7] sm:$0xff] %vm709_vm2, %v687_v17 }
 0x316   :  { %v690_v12 = vpop.xlane.xlu1 %689  ;;  %v696_v47 = vpop.xlane.xlu0 %695 }
 0x317   :  { %711 = vst.msk [vmem:[%s1388_s7 + $0x8] sm:$0xff] %vm709_vm2, %v690_v12  ;;  %713 = vst.msk [vmem:[%s1388_s7 + $0x18] sm:$0xff] %vm709_vm2, %v696_v47 }
 0x31c   :  { %v705_v59 = vpop.xlane.xlu1 %704 }
 0x31d   :  { %716 = vst.msk [vmem:[%s1388_s7 + $0x30] sm:$0xff] %vm709_vm2, %v705_v59 }
 0x320   :  { %v708_v41 = vpop.xlane.xlu0 %707  ;;  %v699_v49 = vpop.xlane.xlu1 %698 }
 0x321   :  { %717 = vst.msk [vmem:[%s1388_s7 + $0x38] sm:$0xff] %vm709_vm2, %v708_v41  ;;  %714 = vst.msk [vmem:[%s1388_s7 + $0x20] sm:$0xff] %vm709_vm2, %v699_v49 }
 0x324   :  { %v702_v58 = vpop.xlane.xlu0 %701  ;;  %v426_v55 = vpop.permute.xlu1 %425 }
 0x325   :  { %715 = vst.msk [vmem:[%s1388_s7 + $0x28] sm:$0xff] %vm709_vm2, %v702_v58  ;;  %v443_v56 = vsel %vm435_vm0, %v394_v52, %v426_v55 }
 0x326   :  { %452 = vst.msk [vmem:[%s1387_s6 + $0x38] sm:$0xff] %vm444_vm1, %v443_v56 }
 0x328   :  { %v424_v19 = vpop.permute.xlu0 %423 }
 0x329   :  { %v442_v31 = vsel %vm435_vm0, %v393_v43, %v424_v19 }
 0x32a   :  { %451 = vst.msk [vmem:[%s1387_s6 + $0x30] sm:$0xff] %vm444_vm1, %v442_v31 }

// kernel: _lambda_.3
= control target key start
LH: loop header
LB: loop body
LE: loop exit
PB: predicated region body
PF: predicated region fallthrough
CT: control target
= control target key end

     0   :  { %vm299_vm0 = vcmask 261120   ;;  %vm304_vm1 = vcmask 523264   ;;  %vm437_vm2 = vcmask 7168   ;;  %s822_s4 = inlined_call_operand.vmem [shape: bf16[128,64], index: 4, kind: input, shape index: {}]   ;;  %s823_s0 = inlined_call_operand.vmem [shape: f32[32,128], index: 0, kind: input, shape index: {}]   ;;  %s824_s1 = inlined_call_operand.vmem [shape: f32[32,128], index: 1, kind: input, shape index: {}]   ;;  %s825_s5 = inlined_call_operand.vmem [shape: f32[1,64], index: 5, kind: input, shape index: {}]   ;;  %s826_s3 = inlined_call_operand.vmem [shape: f32[32,32], index: 3, kind: input, shape index: {}]   ;;  %s827_s2 = inlined_call_operand.vmem [shape: f32[32,32], index: 2, kind: input, shape index: {}]   ;;  %s828_s6 = inlined_call_operand.vmem [shape: f32[32,64], index: 6, kind: output, shape index: {0}]   ;;  %s829_s7 = inlined_call_operand.vmem [shape: f32[32,1], index: 7, kind: output, shape index: {1}]  }
   0x1   :  { %v525_v0 = vld [vmem:[%s822_s4] sm:$0xff]   ;;  %v526_v1 = vld [vmem:[%s822_s4 + $0x8] sm:$0xff]   ;;  %v527_v2 = vld [vmem:[%s822_s4 + $0x10] sm:$0xff]  }
   0x2   :  { %483 = vmatprep.subr.bf16.mxu0 %v525_v0  ;;  %503 = vmatprep.subr.bf16.mxu1 %v525_v0  ;;  %v528_v3 = vld [vmem:[%s822_s4 + $0x18] sm:$0xff]   ;;  %v43_v4 = vld [vmem:[%s823_s0] sm:$0xff]  ;;  %v44_v5 = vld [vmem:[%s823_s0 + $0x8] sm:$0xff] }
   0x3   :  { %484 = vmatpush3.bf16.msra.mxu0 %v525_v0  ;;  %504 = vmatpush3.bf16.msra.mxu1 %v525_v0  ;;  %v49_v6 = vld [vmem:[%s824_s1] sm:$0xff]  ;;  %v47_v7 = vpack.c.bf16 %v44_v5, %v43_v4  ;;  %v50_v8 = vld [vmem:[%s824_s1 + $0x8] sm:$0xff]  ;;  %v531_v12 = vld [vmem:[%s822_s4 + $0x30] sm:$0xff]  }
   0x4   :  { %485 = vmatprep.subr.bf16.mxu0 %v526_v1  ;;  %505 = vmatprep.subr.bf16.mxu1 %v526_v1  ;;  %v53_v9 = vpack.c.bf16 %v50_v8, %v49_v6  ;;  %v529_v10 = vld [vmem:[%s822_s4 + $0x20] sm:$0xff]   ;;  %v530_v11 = vld [vmem:[%s822_s4 + $0x28] sm:$0xff]   ;;  %v532_v13 = vld [vmem:[%s822_s4 + $0x38] sm:$0xff]  }
   0x5   :  { %499 = vmatprep.mubr.bf16.mxu0 %v47_v7  ;;  %v45_v14 = vld [vmem:[%s823_s0 + $0x10] sm:$0xff]  ;;  %v46_v15 = vld [vmem:[%s823_s0 + $0x18] sm:$0xff]  ;;  %v450_v20 = vld [vmem:[%s825_s5] ss:$0 sm:$0xff]  ;;  %s589_s0 = smov 96  }
   0x6   :  { %519 = vmatprep.mubr.bf16.mxu1 %v53_v9  ;;  %v51_v16 = vld [vmem:[%s824_s1 + $0x10] sm:$0xff]  ;;  %v52_v17 = vld [vmem:[%s824_s1 + $0x18] sm:$0xff]  ;;  %v48_v18 = vpack.c.bf16 %v46_v15, %v45_v14  ;;  %s590_s1 = smov 32  }
   0x7   :  { %486 = vmatpush3.bf16.msra.mxu0 %v526_v1  ;;  %506 = vmatpush3.bf16.msra.mxu1 %v526_v1  ;;  %v54_v19 = vpack.c.bf16 %v52_v17, %v51_v16 }
   0x8   :  { %487 = vmatprep.subr.bf16.mxu0 %v527_v2  ;;  %507 = vmatprep.subr.bf16.mxu1 %v527_v2 }
   0xb   :  { %488 = vmatpush3.bf16.msra.mxu0 %v527_v2  ;;  %508 = vmatpush3.bf16.msra.mxu1 %v527_v2 }
   0xc   :  { %489 = vmatprep.subr.bf16.mxu0 %v528_v3  ;;  %509 = vmatprep.subr.bf16.mxu1 %v528_v3 }
   0xf   :  { %490 = vmatpush3.bf16.msra.mxu0 %v528_v3  ;;  %510 = vmatpush3.bf16.msra.mxu1 %v528_v3 }
  0x10   :  { %491 = vmatprep.subr.bf16.mxu0 %v529_v10  ;;  %511 = vmatprep.subr.bf16.mxu1 %v529_v10 }
  0x13   :  { %492 = vmatpush3.bf16.msra.mxu0 %v529_v10  ;;  %512 = vmatpush3.bf16.msra.mxu1 %v529_v10 }
  0x14   :  { %493 = vmatprep.subr.bf16.mxu0 %v530_v11  ;;  %513 = vmatprep.subr.bf16.mxu1 %v530_v11 }
  0x17   :  { %494 = vmatpush3.bf16.msra.mxu0 %v530_v11  ;;  %514 = vmatpush3.bf16.msra.mxu1 %v530_v11 }
  0x18   :  { %495 = vmatprep.subr.bf16.mxu0 %v531_v12  ;;  %515 = vmatprep.subr.bf16.mxu1 %v531_v12 }
  0x1b   :  { %496 = vmatpush3.bf16.msra.mxu0 %v531_v12  ;;  %516 = vmatpush3.bf16.msra.mxu1 %v531_v12 }
  0x1c   :  { %497 = vmatprep.subr.bf16.mxu0 %v532_v13  ;;  %517 = vmatprep.subr.bf16.mxu1 %v532_v13 }
  0x1f   :  { %498 = vmatpush3.bf16.msra.mxu0 %v532_v13  ;;  %518 = vmatpush3.bf16.msra.mxu1 %v532_v13 }
  0x22   :  { %500 = vmatmul.mubr.bf16.vlgmr.msra.gmra.mrb[0].mxu0 %v48_v18  ;;  %520 = vmatmul.mubr.bf16.vlgmr.msra.gmra.mrb[0].mxu1 %v54_v19 }
  0xf5   :  { %v501_v21 = vpop.f32.mrb[0].mxu0  ;;  %v521_v22 = vpop.f32.mrb[0].mxu1 }
  0xf6   :  { %v152_v23 = vadd.f32 %v501_v21, %v450_v20  ;;  %v205_v24 = vadd.f32 %v521_v22, %v450_v20  ;;  %v143_v25 = vpop.f32.mrb[1].mxu0  ;;  %v196_v26 = vpop.f32.mrb[1].mxu1 }
  0xf7   :  { %v144_v27 = vadd.f32 %v450_v20, %v143_v25  ;;  %v197_v28 = vadd.f32 %v450_v20, %v196_v26  ;;  %v502_v29 = vpop.f32.mrb[2].mxu0  ;;  %v522_v30 = vpop.f32.mrb[2].mxu1 }
  0xf8   :  { %v155_v31 = vadd.f32 %v502_v29, %v450_v20  ;;  %v146_v32 = vpop.f32.mrb[3].mxu0  ;;  %v199_v33 = vpop.f32.mrb[3].mxu1  ;;  %533 = vtanh.f32 %v205_v24  ;;  %v208_v34 = vadd.f32 %v522_v30, %v450_v20 }
  0xf9   :  { %v147_v35 = vadd.f32 %v450_v20, %v146_v32  ;;  %535 = vtanh.f32 %v152_v23  ;;  %v200_v36 = vadd.f32 %v450_v20, %v199_v33 }
  0xfa   :  { %537 = vtanh.f32 %v197_v28 }
  0xfb   :  { %539 = vtanh.f32 %v144_v27 }
  0xfc   :  { %541 = vtanh.f32 %v208_v34 }
  0xfd   :  { %543 = vtanh.f32 %v155_v31 }
  0xfe   :  { %545 = vtanh.f32 %v200_v36 }
  0xff   :  { %547 = vtanh.f32 %v147_v35 }
 0x102   :  { %v682_v37 = vpop.eup %533 }
 0x103   :  { %v684_v38 = vpop.eup %535  ;;  %v229_v39 = vmul.f32 0.5, %v682_v37 }
 0x104   :  { %v687_v40 = vpop.eup %537  ;;  %v217_v41 = vmul.f32 0.5, %v684_v38  ;;  %v339_v30 = vsub.f32 %v682_v37, %v684_v38 }
 0x105   :  { %v690_v42 = vpop.eup %539  ;;  %v235_v43 = vmul.f32 1.442695, %v229_v39  ;;  %v227_v44 = vmul.f32 0.5, %v687_v40 }
 0x106   :  { %v693_v45 = vpop.eup %541  ;;  %v215_v46 = vmul.f32 0.5, %v690_v42  ;;  %v223_v51 = vmul.f32 1.442695, %v217_v41  ;;  %v337_v29 = vsub.f32 %v687_v40, %v690_v42  ;;  %v363_v36 = vmul.f32 %v339_v30, %v339_v30  ;;  %v280_v30 = vld [vmem:[%s826_s3 + $0x8] sm:$0xff] }
 0x107   :  { %v696_v47 = vpop.eup %543  ;;  %v230_v48 = vmul.f32 0.5, %v693_v45  ;;  %549 = vpow2.f32 %v235_v43  ;;  %v231_v49 = vmul.f32 1.442695, %v227_v44 }
 0x108   :  { %v699_v50 = vpop.eup %545  ;;  %v218_v52 = vmul.f32 0.5, %v696_v47  ;;  %v219_v56 = vmul.f32 1.442695, %v215_v46  ;;  %v361_v31 = vmul.f32 %v337_v29, %v337_v29  ;;  %v340_v39 = vsub.f32 %v693_v45, %v696_v47 }
 0x109   :  { %v548_v53 = vpop.eup %547  ;;  %v237_v54 = vmul.f32 1.442695, %v230_v48  ;;  %v228_v55 = vmul.f32 0.5, %v699_v50  ;;  %551 = vpow2.f32 %v231_v49 }
 0x10a   :  { %v216_v57 = vmul.f32 0.5, %v548_v53  ;;  %v225_v59 = vmul.f32 1.442695, %v218_v52  ;;  %v338_v32 = vsub.f32 %v699_v50, %v548_v53  ;;  %v364_v48 = vmul.f32 %v340_v39, %v340_v39 }
 0x10b   :  { %553 = vpow2.f32 %v237_v54  ;;  %v233_v58 = vmul.f32 1.442695, %v228_v55 }
 0x10c   :  { %555 = vpow2.f32 %v223_v51  ;;  %v221_v60 = vmul.f32 1.442695, %v216_v57  ;;  %v362_v41 = vmul.f32 %v338_v32, %v338_v32 }
 0x10d   :  { %557 = vpow2.f32 %v233_v58 }
 0x10e   :  { %559 = vpow2.f32 %v219_v56 }
 0x10f   :  { %561 = vpow2.f32 %v225_v59 }
 0x110   :  { %563 = vpow2.f32 %v221_v60 }
 0x111   :  { %v703_v61 = vpop.eup %549 }
 0x112   :  { %v319_v62 = vmul.f32 %v703_v61, %v703_v61 }
 0x113   :  { %v707_v63 = vpop.eup %551 }
 0x114   :  { %v323_v0 = vadd.f32 1e-10, %v319_v62  ;;  %v317_v1 = vmul.f32 %v707_v63, %v707_v63 }
 0x115   :  { %v711_v2 = vpop.eup %553 }
 0x116   :  { %v556_v3 = vpop.eup %555  ;;  %565 = vrcp.f32 %v323_v0  ;;  %v321_v4 = vadd.f32 1e-10, %v317_v1  ;;  %v320_v5 = vmul.f32 %v711_v2, %v711_v2  ;;  %v243_v1 = vmul.f32 0.5, %v707_v63 }
 0x117   :  { %v715_v6 = vpop.eup %557  ;;  %v311_v10 = vmul.f32 %v556_v3, %v556_v3 }
 0x118   :  { %v560_v7 = vpop.eup %559  ;;  %567 = vrcp.f32 %v321_v4  ;;  %v324_v8 = vadd.f32 1e-10, %v320_v5  ;;  %v318_v9 = vmul.f32 %v715_v6, %v715_v6  ;;  %v244_v57 = vmul.f32 0.5, %v715_v6 }
 0x119   :  { %v562_v11 = vpop.eup %561  ;;  %v309_v13 = vmul.f32 %v560_v7, %v560_v7  ;;  %v315_v15 = vadd.f32 1e-10, %v311_v10  ;;  %v247_v10 = vmul.f32 1.442695, %v243_v1 }
 0x11a   :  { %569 = vrcp.f32 %v324_v8  ;;  %v322_v12 = vadd.f32 1e-10, %v318_v9  ;;  %v564_v14 = vpop.eup %563  ;;  %v312_v16 = vmul.f32 %v562_v11, %v562_v11  ;;  %v249_v0 = vmul.f32 1.442695, %v244_v57 }
 0x11b   :  { %v313_v17 = vadd.f32 1e-10, %v309_v13  ;;  %v310_v18 = vmul.f32 %v564_v14, %v564_v14  ;;  %v245_v11 = vmul.f32 0.5, %v703_v61 }
 0x11c   :  { %571 = vrcp.f32 %v322_v12  ;;  %v316_v21 = vadd.f32 1e-10, %v312_v16 }
 0x11d   :  { %v314_v24 = vadd.f32 1e-10, %v310_v18  ;;  %v251_v63 = vmul.f32 1.442695, %v245_v11 }
 0x120   :  { %v566_v19 = vpop.eup %565 }
 0x121   :  { %373 = vrot.lane.b32.xlu1 %v566_v19, %s589_s0  ;;  %v720_v20 = vmul.f32 %v566_v19, %v315_v15  ;;  %v246_v19 = vmul.f32 0.5, %v711_v2  ;;  %v279_v2 = vld [vmem:[%s826_s3] sm:$0xff] }
 0x122   :  { %v568_v22 = vpop.eup %567 }
 0x123   :  { %369 = vrot.lane.b32.xlu0 %v568_v22, %s589_s0  ;;  %v333_v23 = vmul.f32 %v568_v22, %v313_v17 }
 0x124   :  { %v570_v25 = vpop.eup %569 }
 0x125   :  { %375 = vrot.lane.b32.xlu1 %v570_v25, %s589_s0  ;;  %v724_v26 = vmul.f32 %v570_v25, %v316_v21  ;;  %573 = vlog2.f32 %v333_v23 }
 0x126   :  { %v572_v27 = vpop.eup %571  ;;  %575 = vlog2.f32 %v720_v20 }
 0x127   :  { %371 = vrot.lane.b32.xlu0 %v572_v27, %s589_s0  ;;  %v334_v28 = vmul.f32 %v572_v27, %v314_v24 }
 0x129   :  { %577 = vlog2.f32 %v334_v28 }
 0x12a   :  { %579 = vlog2.f32 %v724_v26 }
 0x12b   :  { %581 = vpow2.f32 %v249_v0 }
 0x12c   :  { %583 = vpow2.f32 %v247_v10 }
 0x12d   :  { %585 = vpow2.f32 %v251_v63 }
 0x12f   :  { %v574_v47 = vpop.eup %573 }
 0x130   :  { %v576_v49 = vpop.eup %575  ;;  %v342_v51 = vmul.f32 0.6931472, %v574_v47 }
 0x131   :  { %v346_v55 = vmul.f32 0.6931472, %v576_v49  ;;  %v240_v49 = vld [vmem:[%s827_s2 + $0x8] sm:$0xff] }
 0x132   :  { %v349_v53 = vsub.f32 0.0, %v342_v51 }
 0x133   :  { %v578_v52 = vpop.eup %577  ;;  %v351_v60 = vsub.f32 0.0, %v346_v55 }
 0x134   :  { %v344_v54 = vmul.f32 0.6931472, %v578_v52  ;;  %v580_v56 = vpop.eup %579  ;;  %v459_v58 = vadd.f32 -1.0, %v349_v53 }
 0x135   :  { %v348_v62 = vmul.f32 0.6931472, %v580_v56  ;;  %v461_v5 = vadd.f32 -1.0, %v351_v60  ;;  %v582_v27 = vpop.eup %581  ;;  %v282_v56 = vld [vmem:[%s826_s3 + $0x18] sm:$0xff] }
 0x136   :  { %v350_v59 = vsub.f32 0.0, %v344_v54  ;;  %v357_v3 = vadd.f32 %v459_v58, %v333_v23  ;;  %v242_v54 = vld [vmem:[%s827_s2 + $0x18] sm:$0xff] }
 0x137   :  { %v352_v7 = vsub.f32 0.0, %v348_v62  ;;  %v359_v6 = vadd.f32 %v461_v5, %v720_v20  ;;  %v253_v20 = vmul.f32 1.442695, %v246_v19  ;;  %v281_v62 = vld [vmem:[%s826_s3 + $0x10] sm:$0xff] }
 0x138   :  { %v460_v4 = vadd.f32 -1.0, %v350_v59 }
 0x139   :  { %v462_v14 = vadd.f32 -1.0, %v352_v7  ;;  %587 = vpow2.f32 %v253_v20 }
 0x13a   :  { %v358_v13 = vadd.f32 %v460_v4, %v334_v28 }
 0x13b   :  { %v360_v23 = vadd.f32 %v462_v14, %v724_v26  ;;  %v584_v26 = vpop.eup %583 }
 0x13c   :  { %v586_v28 = vpop.eup %585 }
 0x143   :  { %v588_v29 = vpop.eup %587 }
 0x193   :  { %v374_v33 = vpop.permute.xlu1 %373 }
 0x194   :  { %v383_v44 = vmul.f32 %v374_v33, %v363_v36 }
 0x195   :  { %v370_v34 = vpop.permute.xlu0 %369 }
 0x196   :  { %v381_v35 = vmul.f32 %v370_v34, %v361_v31 }
 0x197   :  { %v376_v46 = vpop.permute.xlu1 %375 }
 0x198   :  { %389 = vrot.lane.b32.xlu0 %v381_v35, %s590_s1  ;;  %v384_v38 = vmul.f32 %v376_v46, %v364_v48  ;;  %v241_v48 = vld [vmem:[%s827_s2 + $0x10] sm:$0xff] }
 0x199   :  { %v372_v43 = vpop.permute.xlu0 %371 }
 0x19a   :  { %v382_v42 = vmul.f32 %v372_v43, %v362_v41  ;;  %v239_v43 = vld [vmem:[%s827_s2] sm:$0xff] }
 0x19c   :  { %391 = vrot.lane.b32.xlu1 %v382_v42, %s590_s1  ;;  %393 = vrot.lane.b32.xlu0 %v383_v44, %s590_s1 }
 0x1a0   :  { %395 = vrot.lane.b32.xlu1 %v384_v38, %s590_s1 }
 0x20a   :  { %v390_v8 = vpop.permute.xlu0 %389 }
 0x20b   :  { %v401_v9 = vadd.f32 %v390_v8, %v357_v3 }
 0x20d   :  { %v405_v12 = vmul.f32 0.5, %v401_v9 }
 0x20e   :  { %v392_v15 = vpop.permute.xlu1 %391  ;;  %v394_v16 = vpop.permute.xlu0 %393 }
 0x20f   :  { %v402_v17 = vadd.f32 %v392_v15, %v358_v13  ;;  %v403_v18 = vadd.f32 %v394_v16, %v359_v6  ;;  %413 = vrot.lane.b32.xlu0 %v405_v12, %s589_s0 }
 0x211   :  { %v406_v21 = vmul.f32 0.5, %v402_v17  ;;  %v407_v22 = vmul.f32 0.5, %v403_v18 }
 0x212   :  { %v396_v61 = vpop.permute.xlu1 %395 }
 0x213   :  { %v404_v24 = vadd.f32 %v396_v61, %v360_v23  ;;  %415 = vrot.lane.b32.xlu1 %v406_v21, %s589_s0  ;;  %417 = vrot.lane.b32.xlu0 %v407_v22, %s589_s0 }
 0x215   :  { %v408_v25 = vmul.f32 0.5, %v404_v24 }
 0x217   :  { %419 = vrot.lane.b32.xlu1 %v408_v25, %s589_s0  ;;  %261 = vrot.lane.b32.xlu0 %v582_v27, %s589_s0 }
 0x21b   :  { %259 = vrot.lane.b32.xlu1 %v584_v26, %s589_s0  ;;  %287 = vrot.lane.b32.xlu0 %v279_v2, %s590_s1 }
 0x21f   :  { %263 = vrot.lane.b32.xlu1 %v586_v28, %s589_s0 }
 0x223   :  { %265 = vrot.lane.b32.xlu1 %v588_v29, %s589_s0 }
 0x227   :  { %289 = vrot.lane.b32.xlu1 %v280_v30, %s590_s1 }
 0x281   :  { %v414_v31 = vpop.permute.xlu0 %413 }
 0x282   :  { %v425_v39 = vsel %vm299_vm0, %v414_v31, 0.0 }
 0x285   :  { %v416_v32 = vpop.permute.xlu1 %415  ;;  %v418_v33 = vpop.permute.xlu0 %417 }
 0x286   :  { %v428_v34 = vsel %vm299_vm0, %v416_v32, 0.0  ;;  %v431_v35 = vsel %vm299_vm0, %v418_v33, 0.0 }
 0x287   :  { %429 = vadd.xlane.f32.xlu1 %v428_v34  ;;  %432 = vadd.xlane.f32.xlu0 %v431_v35 }
 0x289   :  { %v420_v36 = vpop.permute.xlu1 %419  ;;  %v262_v41 = vpop.permute.xlu0 %261 }
 0x28a   :  { %v434_v46 = vsel %vm299_vm0, %v420_v36, 0.0  ;;  %v272_v55 = vmul.f32 %v262_v41, %v240_v49 }
 0x28b   :  { %426 = vadd.xlane.f32.xlu0 %v425_v39 }
 0x28c   :  { %v276_v58 = vadd.f32 %v699_v50, %v272_v55 }
 0x28d   :  { %v260_v44 = vpop.permute.xlu1 %259  ;;  %v288_v38 = vpop.permute.xlu0 %287 }
 0x28e   :  { %v271_v42 = vmul.f32 %v260_v44, %v239_v43 }
 0x28f   :  { %435 = vadd.xlane.f32.xlu0 %v434_v46 }
 0x290   :  { %v275_v47 = vadd.f32 %v687_v40, %v271_v42 }
 0x291   :  { %v264_v51 = vpop.permute.xlu1 %263 }
 0x292   :  { %v273_v52 = vmul.f32 %v264_v51, %v241_v48  ;;  %v300_v53 = vsel %vm299_vm0, %v275_v47, %v288_v38 }
 0x293   :  { %305 = vst.msk [vmem:[%s828_s6] sm:$0xff] %vm304_vm1, %v300_v53 }
 0x295   :  { %v266_v40 = vpop.permute.xlu1 %265 }
 0x296   :  { %v274_v57 = vmul.f32 %v266_v40, %v242_v54 }
 0x298   :  { %293 = vrot.lane.b32.xlu1 %v282_v56, %s590_s1  ;;  %v278_v50 = vadd.f32 %v693_v45, %v274_v57  ;;  %v277_v45 = vadd.f32 %v682_v37, %v273_v52 }
 0x299   :  { %v290_v59 = vpop.permute.xlu1 %289 }
 0x29a   :  { %v301_v60 = vsel %vm299_vm0, %v276_v58, %v290_v59 }
 0x29b   :  { %306 = vst.msk [vmem:[%s828_s6 + $0x8] sm:$0xff] %vm304_vm1, %v301_v60 }
 0x2a5   :  { %291 = vrot.lane.b32.xlu0 %v281_v62, %s590_s1 }
 0x314   :  { %v430_v0 = vpop.xlane.xlu1 %429  ;;  %v433_v1 = vpop.xlane.xlu0 %432 }
 0x315   :  { %439 = vst.msk [vmem:[%s829_s7 + $0x8] sm:$0xff] %vm437_vm2, %v430_v0  ;;  %440 = vst.msk [vmem:[%s829_s7 + $0x10] sm:$0xff] %vm437_vm2, %v433_v1 }
 0x318   :  { %v294_v3 = vpop.permute.xlu1 %293  ;;  %v427_v4 = vpop.xlane.xlu0 %426 }
 0x319   :  { %v303_v5 = vsel %vm299_vm0, %v278_v50, %v294_v3  ;;  %438 = vst.msk [vmem:[%s829_s7] sm:$0xff] %vm437_vm2, %v427_v4 }
 0x31a   :  { %308 = vst.msk [vmem:[%s828_s6 + $0x18] sm:$0xff] %vm304_vm1, %v303_v5 }
 0x31c   :  { %v436_v7 = vpop.xlane.xlu0 %435 }
 0x31d   :  { %441 = vst.msk [vmem:[%s829_s7 + $0x18] sm:$0xff] %vm437_vm2, %v436_v7 }
 0x320   :  { %v292_v8 = vpop.permute.xlu0 %291 }
 0x321   :  { %v302_v9 = vsel %vm299_vm0, %v277_v45, %v292_v8 }
 0x322   :  { %307 = vst.msk [vmem:[%s828_s6 + $0x10] sm:$0xff] %vm304_vm1, %v302_v9 }

// kernel: _lambda_.5
= control target key start
LH: loop header
LB: loop body
LE: loop exit
PB: predicated region body
PF: predicated region fallthrough
CT: control target
= control target key end

     0   :  { %v133_v0 = vlaneseq  ;;  %v1124_v1 = vmov 1966171168   ;;  %vm226_vm0 = vcmask 518144   ;;  %s1950_s0 = inlined_call_operand.vmem [shape: f32[8,64], index: 0, kind: input, shape index: {}]   ;;  %s1951_s1 = inlined_call_operand.vmem [shape: f32[8,64], index: 1, kind: input, shape index: {}]   ;;  %s1952_s2 = inlined_call_operand.vmem [shape: f32[8,64], index: 2, kind: input, shape index: {}]   ;;  %s1953_s3 = inlined_call_operand.vmem [shape: f32[8,3,64], index: 3, kind: input, shape index: {}]   ;;  %s1954_s4 = inlined_call_operand.vmem [shape: f32[8,3,64], index: 4, kind: input, shape index: {}]   ;;  %s1955_s5 = inlined_call_operand.vmem [shape: f32[8,3,64], index: 5, kind: input, shape index: {}]   ;;  %s1956_s6 = inlined_call_operand.hbm [shape: f32[1,1], index: 6, kind: output, shape index: {}]  }
   0x1   :  { %v131_v2 = vunpack.c.l.s4 %v1124_v1  ;;  %v1164_v3 = vld [vmem:[%s1951_s1] sm:$0xff] }
   0x2   :  { %v1167_v4 = vshrl.u32 %v133_v0, 7  ;;  %v1172_v6 = vld [vmem:[%s1950_s0] sm:$0xff]  ;;  %v380_v7 = vcombine.high %v1164_v3, %v1164_v3 }
   0x3   :  { %v132_v5 = vunpack.c.0.s8 %v131_v2  ;;  %v1179_v8 = vld [vmem:[%s1952_s2] sm:$0xff]  ;;  %v129_v9 = vcombine.high %v1172_v6, %v1172_v6 }
   0x4   :  { %v1187_v11 = vsub.s32 0, %v1167_v4  ;;  %v112_v17 = vld [vmem:[%s1954_s4] sm:$0x7] }
   0x5   :  { %v1184_v10 = vsub.s32 %v132_v5, %v1167_v4 }
   0x7   :  { %v387_v12 = vrot.slane %v1164_v3, %v1184_v10  ;;  %v136_v13 = vrot.slane %v1172_v6, %v1184_v10  ;;  %v1194_v14 = vrot.slane %v380_v7, %v1184_v10  ;;  %v645_v15 = vrot.slane %v1179_v8, %v1184_v10 }
   0x8   :  { %v1199_v16 = vrot.slane %v129_v9, %v1184_v10 }
   0x9   :  { %v403_v18 = vrot.slane %v387_v12, %v1184_v10  ;;  %v152_v19 = vrot.slane %v136_v13, %v1184_v10  ;;  %v1208_v20 = vrot.slane %v1194_v14, %v1184_v10  ;;  %v1211_v21 = vrot.slane %v645_v15, %v1184_v10 }
   0xa   :  { %11 = vsyncpa [#allocation3], 0  ;;  %v104_v22 = vld [vmem:[%s1953_s3] sm:$0x7]  ;;  %v116_v23 = vld [vmem:[%s1954_s4 + $0x10] sm:$0x7]  ;;  %v395_v25 = vcombine.high %v387_v12, %v387_v12  ;;  %v1224_v26 = vrot.slane %v1199_v16, %v1184_v10  ;;  %v144_v27 = vcombine.high %v136_v13, %v136_v13  ;;  %v653_v28 = vcombine.high %v645_v15, %v645_v15 }
   0xb   :  { %v120_v24 = vld [vmem:[%s1955_s5] sm:$0x7]  ;;  %v432_v29 = vrot.slane %v403_v18, %v1187_v11  ;;  %v181_v30 = vrot.slane %v152_v19, %v1187_v11  ;;  %v448_v31 = vrot.slane %v1208_v20, %v1187_v11  ;;  %v690_v32 = vrot.slane %v1211_v21, %v1187_v11  ;;  %v108_v41 = vld [vmem:[%s1953_s3 + $0x10] sm:$0x7]  ;;  %v113_v42 = vld [vmem:[%s1954_s4 + $0x4] sm:$0x7] }
   0xc   :  { %v417_v33 = vrot.slane %v395_v25, %v1184_v10  ;;  %v197_v34 = vrot.slane %v1224_v26, %v1187_v11  ;;  %v425_v35 = vcombine.high %v403_v18, %v403_v18  ;;  %v166_v36 = vrot.slane %v144_v27, %v1184_v10  ;;  %v114_v49 = vld [vmem:[%s1954_s4 + $0x8] sm:$0x7]  ;;  %v105_v53 = vld [vmem:[%s1953_s3 + $0x4] sm:$0x7]  ;;  %v115_v18 = vld [vmem:[%s1954_s4 + $0xc] sm:$0x7] }
   0xd   :  { %v469_v37 = vmul.f32 %v432_v29, %v112_v17  ;;  %v218_v38 = vmul.f32 %v181_v30, %v104_v22  ;;  %v473_v39 = vmul.f32 %v448_v31, %v116_v23  ;;  %v727_v40 = vmul.f32 %v690_v32, %v120_v24  ;;  %v121_v2 = vld [vmem:[%s1955_s5 + $0x4] sm:$0x7]  ;;  %v106_v5 = vld [vmem:[%s1953_s3 + $0x8] sm:$0x7]  ;;  %v107_v22 = vld [vmem:[%s1953_s3 + $0xc] sm:$0x7] }
   0xe   :  { %v436_v43 = vrot.slane %v417_v33, %v1187_v11  ;;  %v440_v46 = vrot.slane %v425_v35, %v1187_v11  ;;  %v222_v48 = vmul.f32 %v197_v34, %v108_v41  ;;  %v185_v50 = vrot.slane %v166_v36, %v1187_v11  ;;  %v122_v31 = vld [vmem:[%s1955_s5 + $0x8] sm:$0x7]  ;;  %v117_v41 = vld [vmem:[%s1954_s4 + $0x14] sm:$0x7]  ;;  %s1112_s24 = scalar_lea.hbm %s1956_s6, 16 }
   0xf   :  { %v477_v44 = vsel %vm226_vm0, %v469_v37, 0.0  ;;  %v227_v45 = vsel %vm226_vm0, %v218_v38, 0.0  ;;  %v489_v47 = vsel %vm226_vm0, %v473_v39, 0.0  ;;  %v735_v51 = vsel %vm226_vm0, %v727_v40, 0.0  ;;  %p1113_p0 = scmp.ne.s32.totalorder %s1956_s6, %s1112_s24  ;;  %p1116_p1 = scmp.lt.u32.totalorder %s1112_s24, %s1956_s6 }
  0x10   :  { %478 = vadd.xlane.f32.xlu1 %v477_v44  ;;  %228 = vadd.xlane.f32.xlu0 %v227_v45  ;;  %v470_v52 = vmul.f32 %v436_v43, %v113_v42  ;;  %v675_v54 = vrot.slane %v653_v28, %v1184_v10  ;;  %v174_v55 = vcombine.high %v152_v19, %v152_v19  ;;  %v239_v57 = vsel %vm226_vm0, %v222_v48, 0.0  ;;  %v123_v42 = vld [vmem:[%s1955_s5 + $0xc] sm:$0x7] }
  0x11   :  { %v471_v56 = vmul.f32 %v440_v46, %v114_v49  ;;  %v219_v58 = vmul.f32 %v185_v50, %v105_v53  ;;  %v427_v59 = vcombine.high %v417_v33, %v417_v33  ;;  %v176_v60 = vcombine.high %v166_v36, %v166_v36  ;;  %v109_v33 = vld [vmem:[%s1953_s3 + $0x14] sm:$0x7]  ;;  %p1118_p2 = pnand %p1116_p1, %p1113_p0 }
  0x12   :  { %v480_v61 = vsel %vm226_vm0, %v470_v52, 0.0  ;;  %v694_v62 = vrot.slane %v675_v54, %v1187_v11  ;;  %v189_v63 = vrot.slane %v174_v55, %v1187_v11  ;;  %v145_v1 = vcombine.high %v1199_v16, %v1199_v16 }
  0x13   :  { %v683_v7 = vcombine.high %v1211_v21, %v1211_v21  ;;  %v483_v9 = vsel %vm226_vm0, %v471_v56, 0.0  ;;  %v230_v12 = vsel %vm226_vm0, %v219_v58, 0.0  ;;  %v444_v13 = vrot.slane %v427_v59, %v1187_v11 }
  0x14   :  { %490 = vadd.xlane.f32.xlu1 %v489_v47  ;;  %736 = vadd.xlane.f32.xlu0 %v735_v51  ;;  %v396_v15 = vcombine.high %v1194_v14, %v1194_v14  ;;  %v728_v16 = vmul.f32 %v694_v62, %v121_v2  ;;  %v220_v17 = vmul.f32 %v189_v63, %v106_v5  ;;  %v111_v62 = vld [vmem:[%s1953_s3 + $0x1c] sm:$0x7]  ;;  %vm43_vm1 = vcmask 523264  }
  0x15   :  { %v193_v19 = vrot.slane %v176_v60, %v1187_v11  ;;  %v173_v21 = vrot.slane %v145_v1, %v1184_v10  ;;  %v698_v23 = vrot.slane %v683_v7, %v1187_v11  ;;  %v638_v24 = vcombine.high %v1179_v8, %v1179_v8 }
  0x16   :  { %v472_v14 = vmul.f32 %v444_v13, %v115_v18  ;;  %v424_v25 = vrot.slane %v396_v15, %v1184_v10  ;;  %v685_v27 = vcombine.high %v675_v54, %v675_v54  ;;  %v738_v28 = vsel %vm226_vm0, %v728_v16, 0.0  ;;  %v119_v13 = vld [vmem:[%s1954_s4 + $0x1c] sm:$0x7] }
  0x17   :  { %v233_v29 = vsel %vm226_vm0, %v220_v17, 0.0  ;;  %v221_v30 = vmul.f32 %v193_v19, %v107_v22  ;;  %v201_v32 = vrot.slane %v173_v21, %v1187_v11  ;;  %v652_v34 = vrot.slane %v638_v24, %v1184_v10  ;;  %v126_v24 = vld [vmem:[%s1955_s5 + $0x18] sm:$0x7] }
  0x18   :  { %481 = vadd.xlane.f32.xlu1 %v480_v61  ;;  %240 = vadd.xlane.f32.xlu0 %v239_v57  ;;  %v486_v35 = vsel %vm226_vm0, %v472_v14, 0.0  ;;  %v729_v36 = vmul.f32 %v698_v23, %v122_v31  ;;  %v452_v37 = vrot.slane %v424_v25, %v1187_v11  ;;  %v702_v38 = vrot.slane %v685_v27, %v1187_v11  ;;  %v124_v61 = vld [vmem:[%s1955_s5 + $0x10] sm:$0x7]  ;;  %v127_v14 = vld [vmem:[%s1955_s5 + $0x1c] sm:$0x7] }
  0x19   :  { %v236_v39 = vsel %vm226_vm0, %v221_v30, 0.0  ;;  %v223_v40 = vmul.f32 %v201_v32, %v109_v33  ;;  %v175_v43 = vcombine.high %v1224_v26, %v1224_v26  ;;  %v426_v44 = vcombine.high %v1208_v20, %v1208_v20  ;;  %v110_v20 = vld [vmem:[%s1953_s3 + $0x18] sm:$0x7] }
  0x1a   :  { %v668_v45 = vrot.slane %v652_v34, %v1184_v10  ;;  %v741_v46 = vsel %vm226_vm0, %v729_v36, 0.0  ;;  %v474_v47 = vmul.f32 %v452_v37, %v117_v41  ;;  %v730_v48 = vmul.f32 %v702_v38, %v123_v42  ;;  %v118_v26 = vld [vmem:[%s1954_s4 + $0x18] sm:$0x7] }
  0x1b   :  { %v177_v49 = vcombine.high %v173_v21, %v173_v21  ;;  %v242_v50 = vsel %vm226_vm0, %v223_v40, 0.0  ;;  %v205_v51 = vrot.slane %v175_v43, %v1187_v11  ;;  %v456_v52 = vrot.slane %v426_v44, %v1187_v11 }
  0x1c   :  { %484 = vadd.xlane.f32.xlu1 %v483_v9  ;;  %231 = vadd.xlane.f32.xlu0 %v230_v12  ;;  %v654_v53 = vcombine.high %v652_v34, %v652_v34  ;;  %v428_v54 = vcombine.high %v424_v25, %v424_v25  ;;  %v492_v55 = vsel %vm226_vm0, %v474_v47, 0.0  ;;  %v706_v56 = vrot.slane %v668_v45, %v1187_v11 }
  0x1d   :  { %v209_v57 = vrot.slane %v177_v49, %v1187_v11  ;;  %v744_v58 = vsel %vm226_vm0, %v730_v48, 0.0  ;;  %v224_v59 = vmul.f32 %v205_v51, %v110_v20  ;;  %v475_v60 = vmul.f32 %v456_v52, %v118_v26 }
  0x1e   :  { %v682_v63 = vrot.slane %v654_v53, %v1184_v10  ;;  %v460_v1 = vrot.slane %v428_v54, %v1187_v11  ;;  %v731_v2 = vmul.f32 %v706_v56, %v124_v61  ;;  %v684_v7 = vcombine.high %v668_v45, %v668_v45  ;;  %v125_v10 = vld [vmem:[%s1955_s5 + $0x14] sm:$0x7] }
  0x1f   :  { %v225_v5 = vmul.f32 %v209_v57, %v111_v62  ;;  %v245_v9 = vsel %vm226_vm0, %v224_v59, 0.0  ;;  %v495_v12 = vsel %vm226_vm0, %v475_v60, 0.0  ;;  %v62_v25 = vadd.f32 %v1179_v8, %v1172_v6 }
  0x20   :  { %739 = vadd.xlane.f32.xlu1 %v738_v28  ;;  %234 = vadd.xlane.f32.xlu0 %v233_v29  ;;  %v710_v15 = vrot.slane %v682_v63, %v1187_v11  ;;  %v686_v16 = vcombine.high %v682_v63, %v682_v63  ;;  %v747_v17 = vsel %vm226_vm0, %v731_v2, 0.0  ;;  %v476_v18 = vmul.f32 %v460_v1, %v119_v13 }
  0x21   :  { %v248_v19 = vsel %vm226_vm0, %v225_v5, 0.0  ;;  %v714_v22 = vrot.slane %v684_v7, %v1187_v11  ;;  %v41_v27 = vadd.f32 %v1179_v8, %v1164_v3  ;;  %v83_v31 = vadd.f32 %v1164_v3, %v1172_v6 }
  0x22   :  { %v732_v21 = vmul.f32 %v710_v15, %v125_v10  ;;  %v718_v23 = vrot.slane %v686_v16, %v1187_v11  ;;  %v498_v28 = vsel %vm226_vm0, %v476_v18, 0.0  ;;  %v63_v34 = vmul.f32 %v62_v25, %v1164_v3 }
  0x23   :  { %v733_v29 = vmul.f32 %v714_v22, %v126_v24  ;;  %v84_v38 = vmul.f32 %v83_v31, %v1179_v8  ;;  %vm949_vm11 = vcmask 1041409  }
  0x24   :  { %487 = vadd.xlane.f32.xlu1 %v486_v35  ;;  %237 = vadd.xlane.f32.xlu0 %v236_v39  ;;  %v750_v11 = vsel %vm226_vm0, %v732_v21, 0.0  ;;  %v734_v30 = vmul.f32 %v718_v23, %v127_v14  ;;  %v42_v35 = vmul.f32 %v41_v27, %v1172_v6  ;;  %v64_v36 = vsel %vm43_vm1, %v63_v34, 0.0 }
  0x25   :  { %v753_v32 = vsel %vm226_vm0, %v733_v29, 0.0  ;;  %v85_v39 = vsel %vm43_vm1, %v84_v38, 0.0  ;;  %v916_v14 = vand.u32 127, %v133_v0 }
  0x26   :  { %v756_v33 = vsel %vm226_vm0, %v734_v30, 0.0  ;;  %v44_v37 = vsel %vm43_vm1, %v42_v35, 0.0 }
  0x28   :  { %742 = vadd.xlane.f32.xlu0 %v741_v46  ;;  %243 = vadd.xlane.f32.xlu1 %v242_v50 }
  0x2c   :  { %493 = vadd.xlane.f32.xlu0 %v492_v55  ;;  %745 = vadd.xlane.f32.xlu1 %v744_v58 }
  0x30   :  { %246 = vadd.xlane.f32.xlu0 %v245_v9  ;;  %496 = vadd.xlane.f32.xlu1 %v495_v12 }
  0x34   :  { %748 = vadd.xlane.f32.xlu0 %v747_v17  ;;  %249 = vadd.xlane.f32.xlu1 %v248_v19 }
  0x38   :  { %499 = vadd.xlane.f32.xlu0 %v498_v28  ;;  %751 = vadd.xlane.f32.xlu1 %v750_v11 }
  0x3c   :  { %754 = vadd.xlane.f32.xlu0 %v753_v32  ;;  %757 = vadd.xlane.f32.xlu1 %v756_v33  ;;  %v1393_v33 = vsub.s32 %v916_v14, %v1167_v4 }
  0x40   :  { %65 = vadd.xlane.f32.xlu1 %v64_v36  ;;  %45 = vadd.xlane.f32.xlu0 %v44_v37 }
  0x44   :  { %86 = vadd.xlane.f32.xlu0 %v85_v39 }
  0x9d   :  { %v1366_v40 = vpop.xlane.xlu1 %478  ;;  %v1368_v41 = vpop.xlane.xlu0 %228 }
  0x9e   :  { %v501_v42 = vsub.f32 0.0, %v1366_v40  ;;  %v251_v3 = vsub.f32 0.0, %v1368_v41 }
  0xa0   :  { %v517_v6 = vand.u32 2147483647, %v501_v42  ;;  %v267_v43 = vand.u32 2147483647, %v251_v3  ;;  %v1398_v35 = vmin.f32 %v501_v42, 0.0  ;;  %v1402_v36 = vmin.f32 %v251_v3, 0.0 }
  0xa1   :  { %v491_v44 = vpop.xlane.xlu1 %490  ;;  %v1376_v8 = vpop.xlane.xlu0 %736 }
  0xa2   :  { %v525_v45 = vsub.f32 0.0, %v517_v6  ;;  %v505_v46 = vsub.f32 0.0, %v491_v44  ;;  %v759_v47 = vsub.f32 0.0, %v1376_v8  ;;  %v275_v48 = vsub.f32 0.0, %v267_v43 }
  0xa4   :  { %v521_v49 = vand.u32 2147483647, %v505_v46  ;;  %v533_v52 = vmul.f32 1.442695, %v525_v45  ;;  %v775_v53 = vand.u32 2147483647, %v759_v47 }
  0xa5   :  { %v482_v50 = vpop.xlane.xlu1 %481  ;;  %v241_v51 = vpop.xlane.xlu0 %240  ;;  %v283_v54 = vmul.f32 1.442695, %v275_v48  ;;  %v1404_v37 = vmin.f32 %v505_v46, 0.0  ;;  %v1407_v4 = vmin.f32 %v759_v47, 0.0 }
  0xa6   :  { %v502_v20 = vsub.f32 0.0, %v482_v50  ;;  %v255_v26 = vsub.f32 0.0, %v241_v51  ;;  %v529_v55 = vsub.f32 0.0, %v521_v49  ;;  %1004 = vpow2.f32 %v533_v52 }
  0xa7   :  { %v783_v58 = vsub.f32 0.0, %v775_v53  ;;  %1006 = vpow2.f32 %v283_v54 }
  0xa8   :  { %v518_v59 = vand.u32 2147483647, %v502_v20  ;;  %v271_v60 = vand.u32 2147483647, %v255_v26  ;;  %v541_v62 = vmul.f32 1.442695, %v529_v55 }
  0xa9   :  { %v485_v56 = vpop.xlane.xlu1 %484  ;;  %v232_v57 = vpop.xlane.xlu0 %231  ;;  %v791_v1 = vmul.f32 1.442695, %v783_v58  ;;  %v1409_v6 = vmin.f32 %v502_v20, 0.0  ;;  %v1413_v42 = vmin.f32 %v255_v26, 0.0 }
  0xaa   :  { %v252_v61 = vsub.f32 0.0, %v232_v57  ;;  %v526_v2 = vsub.f32 0.0, %v518_v59  ;;  %v279_v5 = vsub.f32 0.0, %v271_v60  ;;  %v503_v9 = vsub.f32 0.0, %v485_v56 }
  0xab   :  { %1008 = vpow2.f32 %v541_v62 }
  0xac   :  { %v268_v12 = vand.u32 2147483647, %v252_v61  ;;  %1010 = vpow2.f32 %v791_v1  ;;  %v535_v13 = vmul.f32 1.442695, %v526_v2  ;;  %v291_v16 = vmul.f32 1.442695, %v279_v5 }
  0xad   :  { %v740_v63 = vpop.xlane.xlu1 %739  ;;  %v235_v15 = vpop.xlane.xlu0 %234  ;;  %v519_v18 = vand.u32 2147483647, %v503_v9  ;;  %v1419_v44 = vmin.f32 %v503_v9, 0.0  ;;  %v1421_v8 = vmin.f32 %v252_v61, 0.0 }
  0xae   :  { %v760_v7 = vsub.f32 0.0, %v740_v63  ;;  %v276_v19 = vsub.f32 0.0, %v268_v12  ;;  %v253_v21 = vsub.f32 0.0, %v235_v15  ;;  %1012 = vpow2.f32 %v535_v13 }
  0xaf   :  { %1014 = vpow2.f32 %v291_v16  ;;  %v527_v25 = vsub.f32 0.0, %v519_v18 }
  0xb0   :  { %v776_v10 = vand.u32 2147483647, %v760_v7  ;;  %v1379_v17 = vpop.eup %1004  ;;  %v285_v27 = vmul.f32 1.442695, %v276_v19  ;;  %v269_v28 = vand.u32 2147483647, %v253_v21 }
  0xb1   :  { %v1381_v22 = vpop.eup %1006  ;;  %v549_v23 = vadd.f32 1.0, %v1379_v17  ;;  %v1385_v11 = vpop.xlane.xlu1 %487  ;;  %v537_v34 = vmul.f32 1.442695, %v527_v25  ;;  %v552_v43 = vmul.f32 -0.5, %v1379_v17  ;;  %v555_v47 = vand.u32 2147483647, %v1379_v17 }
  0xb2   :  { %v784_v24 = vsub.f32 0.0, %v776_v10  ;;  %v299_v29 = vadd.f32 1.0, %v1381_v22  ;;  %v504_v0 = vsub.f32 0.0, %v1385_v11  ;;  %v277_v38 = vsub.f32 0.0, %v269_v28  ;;  %v1415_v41 = vpop.xlane.xlu0 %237 }
  0xb3   :  { %1016 = vlog2.f32 %v549_v23  ;;  %v302_v48 = vmul.f32 -0.5, %v1381_v22  ;;  %v1429_v49 = vmin.f32 %v760_v7, 0.0  ;;  %v305_v51 = vand.u32 2147483647, %v1381_v22 }
  0xb4   :  { %v793_v31 = vmul.f32 1.442695, %v784_v24  ;;  %1018 = vpow2.f32 %v285_v27  ;;  %v520_v45 = vand.u32 2147483647, %v504_v0  ;;  %v287_v50 = vmul.f32 1.442695, %v277_v38 }
  0xb5   :  { %v1388_v30 = vpop.eup %1008  ;;  %1020 = vlog2.f32 %v299_v29  ;;  %v553_v20 = vadd.f32 1.0, %v552_v43  ;;  %v1437_v56 = vmin.f32 %v253_v21, 0.0  ;;  %v254_v58 = vsub.f32 0.0, %v1415_v41  ;;  %v1456_v16 = vpop.xlane.xlu1 %243 }
  0xb6   :  { %v1390_v32 = vpop.eup %1010  ;;  %v585_v39 = vadd.f32 1.0, %v1388_v30  ;;  %1022 = vpow2.f32 %v793_v31  ;;  %v588_v52 = vmul.f32 -0.5, %v1388_v30  ;;  %v528_v57 = vsub.f32 0.0, %v520_v45  ;;  %v1445_v63 = vpop.xlane.xlu0 %742 }
  0xb7   :  { %v807_v40 = vadd.f32 1.0, %v1390_v32  ;;  %1024 = vpow2.f32 %v537_v34  ;;  %v810_v53 = vmul.f32 -0.5, %v1390_v32  ;;  %vm1440_vm2 = vcmp.lt.f32.partialorder %v555_v47, 0.0004427343 }
  0xb8   :  { %v1417_v3 = vpop.eup %1012  ;;  %1026 = vlog2.f32 %v585_v39  ;;  %v303_v61 = vadd.f32 1.0, %v302_v48  ;;  %vm1449_vm3 = vcmp.lt.f32.partialorder %v305_v51, 0.0004427343  ;;  %v589_v5 = vadd.f32 1.0, %v588_v52 }
  0xb9   :  { %v1425_v46 = vpop.eup %1014  ;;  %1028 = vlog2.f32 %v807_v40  ;;  %v558_v26 = vadd.f32 1.0, %v1417_v3  ;;  %v561_v54 = vmul.f32 -0.5, %v1417_v3  ;;  %v591_v7 = vand.u32 2147483647, %v1388_v30 }
  0xba   :  { %v335_v55 = vadd.f32 1.0, %v1425_v46  ;;  %v338_v62 = vmul.f32 -0.5, %v1425_v46  ;;  %1030 = vpow2.f32 %v287_v50  ;;  %v811_v9 = vadd.f32 1.0, %v810_v53  ;;  %v1493_v48 = vpop.xlane.xlu0 %493 }
  0xbb   :  { %v554_v12 = vmul.f32 %v1379_v17, %v553_v20  ;;  %v813_v13 = vand.u32 2147483647, %v1390_v32  ;;  %1032 = vlog2.f32 %v558_v26  ;;  %v562_v15 = vadd.f32 1.0, %v561_v54 }
  0xbc   :  { %1034 = vlog2.f32 %v335_v55  ;;  %v539_v18 = vmul.f32 1.442695, %v528_v57  ;;  %v270_v19 = vand.u32 2147483647, %v254_v58  ;;  %v761_v21 = vsub.f32 0.0, %v1445_v63 }
  0xbd   :  { %v1017_v59 = vpop.eup %1016  ;;  %v304_v14 = vmul.f32 %v1381_v22, %v303_v61  ;;  %v339_v17 = vadd.f32 1.0, %v338_v62  ;;  %v1468_v28 = vmul.f32 %v1388_v30, %v589_v5  ;;  %vm1470_vm4 = vcmp.lt.f32.partialorder %v591_v7, 0.0004427343 }
  0xbe   :  { %v1447_v1 = vpop.eup %1018  ;;  %v551_v24 = vmul.f32 0.6931472, %v1017_v59  ;;  %v1475_v31 = vmul.f32 %v1390_v32, %v811_v9  ;;  %v564_v34 = vand.u32 2147483647, %v1417_v3  ;;  %vm1478_vm5 = vcmp.lt.f32.partialorder %v813_v13, 0.0004427343 }
  0xbf   :  { %v1021_v10 = vpop.eup %1020  ;;  %v308_v25 = vadd.f32 1.0, %v1447_v1  ;;  %v1483_v39 = vmul.f32 %v1417_v3, %v562_v15  ;;  %v341_v30 = vand.u32 2147483647, %v1425_v46  ;;  %v1488_v43 = vmin.f32 %v504_v0, 0.0  ;;  %v1501_v0 = vpop.xlane.xlu1 %745 }
  0xc0   :  { %v1461_v23 = vpop.eup %1022  ;;  %v301_v38 = vmul.f32 0.6931472, %v1021_v10  ;;  %1036 = vpow2.f32 %v539_v18  ;;  %v278_v45 = vsub.f32 0.0, %v270_v19  ;;  %v777_v47 = vand.u32 2147483647, %v761_v21 }
  0xc1   :  { %v1465_v27 = vpop.eup %1024  ;;  %v816_v32 = vadd.f32 1.0, %v1461_v23  ;;  %v557_v3 = vsel %vm1440_vm2, %v554_v12, %v551_v24  ;;  %v1498_v51 = vmul.f32 %v1425_v46, %v339_v17  ;;  %1038 = vlog2.f32 %v308_v25  ;;  %v1530_v24 = vpop.xlane.xlu0 %246 }
  0xc2   :  { %v1027_v40 = vpop.eup %1026  ;;  %v567_v11 = vadd.f32 1.0, %v1465_v27  ;;  %v570_v52 = vmul.f32 -0.5, %v1465_v27  ;;  %v289_v53 = vmul.f32 1.442695, %v278_v45  ;;  %v785_v20 = vsub.f32 0.0, %v777_v47 }
  0xc3   :  { %v1029_v50 = vpop.eup %1028  ;;  %v256_v26 = vsub.f32 0.0, %v1456_v16  ;;  %v307_v55 = vsel %vm1449_vm3, %v304_v14, %v301_v38  ;;  %v587_v57 = vmul.f32 0.6931472, %v1027_v40  ;;  %v573_v46 = vand.u32 2147483647, %v1465_v27  ;;  %v1543_v38 = vpop.xlane.xlu1 %496 }
  0xc4   :  { %v1505_v54 = vpop.eup %1030  ;;  %v506_v59 = vsub.f32 0.0, %v1493_v48  ;;  %v809_v60 = vmul.f32 0.6931472, %v1029_v50  ;;  %vm1511_vm6 = vcmp.lt.f32.partialorder %v564_v34, 0.0004427343  ;;  %v311_v5 = vmul.f32 -0.5, %v1447_v1 }
  0xc5   :  { %vm1515_vm7 = vcmp.lt.f32.partialorder %v341_v30, 0.0004427343  ;;  %1040 = vlog2.f32 %v816_v32  ;;  %v762_v2 = vsub.f32 0.0, %v1501_v0  ;;  %v1033_v7 = vpop.eup %1032  ;;  %v621_v9 = vsub.f32 %v1398_v35, %v557_v3 }
  0xc6   :  { %1042 = vlog2.f32 %v567_v11  ;;  %v1524_v12 = vmin.f32 %v254_v58, 0.0  ;;  %v795_v13 = vmul.f32 1.442695, %v785_v20  ;;  %v1035_v15 = vpop.eup %1034  ;;  %v371_v10 = vsub.f32 %v1402_v36, %v307_v55 }
  0xc7   :  { %v317_v18 = vadd.f32 1.0, %v1505_v54  ;;  %1044 = vpow2.f32 %v289_v53  ;;  %v272_v19 = vand.u32 2147483647, %v256_v26  ;;  %v593_v35 = vsel %vm1470_vm4, %v1468_v28, %v587_v57 }
  0xc8   :  { %v571_v14 = vadd.f32 1.0, %v570_v52  ;;  %v314_v41 = vand.u32 2147483647, %v1447_v1  ;;  %v522_v58 = vand.u32 2147483647, %v506_v59  ;;  %v815_v36 = vsel %vm1478_vm5, %v1475_v31, %v809_v60  ;;  %v1572_v60 = vpop.xlane.xlu0 %748 }
  0xc9   :  { %v560_v17 = vmul.f32 0.6931472, %v1033_v7  ;;  %v312_v25 = vadd.f32 1.0, %v311_v5  ;;  %v778_v34 = vand.u32 2147483647, %v762_v2  ;;  %1046 = vpow2.f32 %v795_v13 }
  0xca   :  { %v337_v30 = vmul.f32 0.6931472, %v1035_v15  ;;  %v280_v28 = vsub.f32 0.0, %v272_v19  ;;  %v257_v29 = vsub.f32 0.0, %v1530_v24  ;;  %v1546_v40 = vpop.eup %1036  ;;  %v629_v32 = vadd.f32 %v621_v9, %v371_v10 }
  0xcb   :  { %v819_v45 = vmul.f32 -0.5, %v1461_v23  ;;  %1048 = vlog2.f32 %v317_v18  ;;  %v786_v22 = vsub.f32 0.0, %v778_v34  ;;  %v1039_v31 = vpop.eup %1038  ;;  %v879_v47 = vsub.f32 %v1407_v4, %v815_v36 }
  0xcc   :  { %v1551_v50 = vmul.f32 %v1465_v27, %v571_v14  ;;  %v530_v3 = vsub.f32 0.0, %v522_v58  ;;  %v507_v11 = vsub.f32 0.0, %v1543_v38  ;;  %v625_v52 = vsub.f32 %v1404_v37, %v593_v35 }
  0xcd   :  { %v313_v53 = vmul.f32 %v1447_v1, %v312_v25  ;;  %vm1556_vm8 = vcmp.lt.f32.partialorder %v314_v41, 0.0004427343  ;;  %v797_v55 = vmul.f32 1.442695, %v786_v22  ;;  %v566_v57 = vsel %vm1511_vm6, %v1483_v39, %v560_v17 }
  0xce   :  { %v343_v4 = vsel %vm1515_vm7, %v1498_v51, %v337_v30  ;;  %vm1566_vm9 = vcmp.lt.f32.partialorder %v573_v46, 0.0004427343  ;;  %v293_v37 = vmul.f32 1.442695, %v280_v28  ;;  %v273_v1 = vand.u32 2147483647, %v257_v29 }
  0xcf   :  { %v1041_v5 = vpop.eup %1040  ;;  %v310_v7 = vmul.f32 0.6931472, %v1039_v31  ;;  %v820_v9 = vadd.f32 1.0, %v819_v45  ;;  %v576_v61 = vadd.f32 1.0, %v1546_v40  ;;  %v1577_v39 = vmin.f32 %v761_v21, 0.0  ;;  %v1589_v21 = vpop.xlane.xlu1 %249 }
  0xd0   :  { %v1043_v51 = vpop.eup %1042  ;;  %v1579_v46 = vadd.f32 %v879_v47, %v629_v32  ;;  %v822_v62 = vand.u32 2147483647, %v1461_v23  ;;  %v543_v13 = vmul.f32 1.442695, %v530_v3  ;;  %v523_v15 = vand.u32 2147483647, %v507_v11 }
  0xd1   :  { %v1584_v10 = vpop.eup %1044  ;;  %v622_v18 = vsub.f32 %v1409_v6, %v566_v57  ;;  %v375_v19 = vsub.f32 %v1413_v42, %v343_v4  ;;  %1050 = vpow2.f32 %v797_v55  ;;  %v763_v63 = vsub.f32 0.0, %v1572_v60  ;;  %v1616_v4 = vpop.xlane.xlu0 %499 }
  0xd2   :  { %v818_v35 = vmul.f32 0.6931472, %v1041_v5  ;;  %v320_v14 = vmul.f32 -0.5, %v1505_v54  ;;  %1052 = vpow2.f32 %v293_v37  ;;  %v281_v41 = vsub.f32 0.0, %v273_v1 }
  0xd3   :  { %v569_v58 = vmul.f32 0.6931472, %v1043_v51  ;;  %v316_v36 = vsel %vm1556_vm8, %v313_v53, %v310_v7  ;;  %v821_v17 = vmul.f32 %v1461_v23, %v820_v9  ;;  %1054 = vlog2.f32 %v576_v61  ;;  %v1595_v6 = vpop.eup %1046 }
  0xd4   :  { %v326_v42 = vadd.f32 1.0, %v1584_v10  ;;  %1056 = vpow2.f32 %v543_v13  ;;  %v531_v25 = vsub.f32 0.0, %v523_v15  ;;  %v258_v34 = vsub.f32 0.0, %v1589_v21 }
  0xd5   :  { %v1049_v30 = vpop.eup %1048  ;;  %v920_v28 = vrot.slane %v1579_v46, %v1393_v33  ;;  %vm1601_vm10 = vcmp.lt.f32.partialorder %v822_v62, 0.0004427343  ;;  %v323_v45 = vand.u32 2147483647, %v1505_v54  ;;  %v779_v23 = vand.u32 2147483647, %v763_v63  ;;  %v1626_v62 = vpop.xlane.xlu1 %751 }
  0xd6   :  { %v824_v22 = vsel %vm1601_vm10, %v821_v17, %v818_v35  ;;  %v321_v31 = vadd.f32 1.0, %v320_v14  ;;  %v579_v47 = vmul.f32 -0.5, %v1546_v40  ;;  %v295_v3 = vmul.f32 1.442695, %v281_v41 }
  0xd7   :  { %v575_v53 = vsel %vm1566_vm9, %v1551_v50, %v569_v58  ;;  %v372_v20 = vsub.f32 %v1421_v8, %v316_v36  ;;  %v825_v55 = vadd.f32 1.0, %v1595_v6  ;;  %v787_v57 = vsub.f32 0.0, %v779_v23 }
  0xd8   :  { %v319_v37 = vmul.f32 0.6931472, %v1049_v30  ;;  %1058 = vlog2.f32 %v326_v42  ;;  %v545_v1 = vmul.f32 1.442695, %v531_v25  ;;  %v274_v5 = vand.u32 2147483647, %v258_v34 }
  0xd9   :  { %v1620_v7 = vadd.f32 %v625_v52, %v375_v19  ;;  %v880_v9 = vsub.f32 %v1429_v49, %v824_v22  ;;  %v582_v27 = vand.u32 2147483647, %v1546_v40  ;;  %v799_v50 = vmul.f32 1.442695, %v787_v57 }
  0xda   :  { %v322_v8 = vmul.f32 %v1505_v54, %v321_v31  ;;  %v580_v61 = vadd.f32 1.0, %v579_v47  ;;  %1060 = vpow2.f32 %v295_v3  ;;  %v508_v51 = vsub.f32 0.0, %v1616_v4 }
  0xdb   :  { %v1628_v13 = vpop.eup %1050  ;;  %v623_v15 = vsub.f32 %v1419_v44, %v575_v53  ;;  %v630_v52 = vadd.f32 %v622_v18, %v372_v20  ;;  %vm1631_vm12 = vcmp.lt.f32.partialorder %v323_v45, 0.0004427343  ;;  %1062 = vlog2.f32 %v825_v55 }
  0xdc   :  { %v1635_v49 = vpop.eup %1052  ;;  %v325_v54 = vsel %vm1631_vm12, %v322_v8, %v319_v37  ;;  %v1641_v35 = vmin.f32 %v256_v26, 0.0  ;;  %1064 = vpow2.f32 %v545_v1  ;;  %v282_v14 = vsub.f32 0.0, %v274_v5 }
  0xdd   :  { %v1055_v41 = vpop.eup %1054  ;;  %v888_v58 = vadd.f32 %v880_v9, %v630_v52  ;;  %vm1643_vm13 = vcmp.lt.f32.partialorder %v582_v27, 0.0004427343  ;;  %v1649_v18 = vmin.f32 %v506_v59, 0.0  ;;  %1066 = vpow2.f32 %v799_v50 }
  0xde   :  { %v764_v36 = vsub.f32 0.0, %v1626_v62  ;;  %v1652_v17 = vpop.eup %1056  ;;  %v581_v16 = vmul.f32 %v1546_v40, %v580_v61  ;;  %v329_v26 = vmul.f32 -0.5, %v1584_v10  ;;  %v834_v42 = vadd.f32 1.0, %v1628_v13 }
  0xdf   :  { %v524_v25 = vand.u32 2147483647, %v508_v51  ;;  %v373_v30 = vsub.f32 %v1437_v56, %v325_v54  ;;  %v332_v48 = vand.u32 2147483647, %v1584_v10  ;;  %v344_v59 = vadd.f32 1.0, %v1635_v49  ;;  %v1716_v54 = vpop.xlane.xlu1 %757 }
  0xe0   :  { %v1664_v32 = vmin.f32 %v762_v2, 0.0  ;;  %v1668_v40 = vmin.f32 %v257_v29, 0.0  ;;  %v1672_v45 = vmin.f32 %v507_v11, 0.0  ;;  %v297_v23 = vmul.f32 1.442695, %v282_v14 }
  0xe1   :  { %v532_v22 = vsub.f32 0.0, %v524_v25  ;;  %v924_v56 = vrot.slane %v888_v58, %v1393_v33  ;;  %v578_v31 = vmul.f32 0.6931472, %v1055_v41  ;;  %v594_v47 = vadd.f32 1.0, %v1652_v17 }
  0xe2   :  { %v780_v0 = vand.u32 2147483647, %v764_v36  ;;  %v1059_v2 = vpop.eup %1058  ;;  %v330_v3 = vadd.f32 1.0, %v329_v26  ;;  %v828_v24 = vmul.f32 -0.5, %v1595_v6  ;;  %v831_v29 = vand.u32 2147483647, %v1595_v6 }
  0xe3   :  { %1068 = vlog2.f32 %v834_v42  ;;  %v1680_v38 = vadd.f32 %v623_v15, %v373_v30  ;;  %vm1682_vm14 = vcmp.lt.f32.partialorder %v332_v48, 0.0004427343  ;;  %v1688_v53 = vmin.f32 %v763_v63, 0.0  ;;  %v1709_v15 = vpop.xlane.xlu0 %754 }
  0xe4   :  { %1070 = vlog2.f32 %v344_v59  ;;  %v1690_v20 = vpop.eup %1060  ;;  %v347_v55 = vmul.f32 -0.5, %v1635_v49  ;;  %v597_v57 = vmul.f32 -0.5, %v1652_v17  ;;  %v547_v37 = vmul.f32 1.442695, %v532_v22 }
  0xe5   :  { %1072 = vpow2.f32 %v297_v23  ;;  %v1063_v1 = vpop.eup %1062  ;;  %v1698_v5 = vsel %vm949_vm11, %v924_v56, %v920_v28  ;;  %v328_v9 = vmul.f32 0.6931472, %v1059_v2  ;;  %v788_v60 = vsub.f32 0.0, %v780_v0 }
  0xe6   :  { %1074 = vlog2.f32 %v594_v47  ;;  %v1700_v63 = vpop.eup %1064  ;;  %v584_v27 = vsel %vm1643_vm13, %v581_v16, %v578_v31  ;;  %v331_v50 = vmul.f32 %v1584_v10, %v330_v3  ;;  %v829_v8 = vadd.f32 1.0, %v828_v24 }
  0xe7   :  { %vm1705_vm15 = vcmp.lt.f32.partialorder %v831_v29, 0.0004427343  ;;  %v1711_v46 = vpop.eup %1066  ;;  %v350_v28 = vand.u32 2147483647, %v1635_v49  ;;  %v837_v52 = vmul.f32 -0.5, %v1628_v13  ;;  %v353_v19 = vadd.f32 1.0, %v1690_v20  ;;  %v1739_v2 = vpop.xlane.xlu0 %45 }
  0xe8   :  { %1076 = vpow2.f32 %v547_v37  ;;  %v348_v14 = vadd.f32 1.0, %v347_v55  ;;  %v598_v10 = vadd.f32 1.0, %v597_v57  ;;  %v600_v41 = vand.u32 2147483647, %v1652_v17 }
  0xe9   :  { %v843_v58 = vadd.f32 1.0, %v1711_v46  ;;  %v334_v44 = vsel %vm1682_vm14, %v331_v50, %v328_v9  ;;  %v356_v16 = vmul.f32 -0.5, %v1690_v20  ;;  %v801_v26 = vmul.f32 1.442695, %v788_v60 }
  0xea   :  { %v765_v42 = vsub.f32 0.0, %v1709_v15  ;;  %v624_v25 = vsub.f32 %v1488_v43, %v584_v27  ;;  %v827_v30 = vmul.f32 0.6931472, %v1063_v1  ;;  %v840_v48 = vand.u32 2147483647, %v1628_v13 }
  0xeb   :  { %v603_v59 = vadd.f32 1.0, %v1700_v63  ;;  %v830_v23 = vmul.f32 %v1595_v6, %v829_v8  ;;  %v838_v22 = vadd.f32 1.0, %v837_v52  ;;  %1078 = vlog2.f32 %v353_v19 }
  0xec   :  { %v1730_v56 = vmin.f32 %v258_v34, 0.0  ;;  %v374_v47 = vsub.f32 %v1524_v12, %v334_v44  ;;  %v1734_v0 = vmul.f32 %v1635_v49, %v348_v14  ;;  %v1737_v43 = vmul.f32 %v1652_v17, %v598_v10  ;;  %v1752_v17 = vpop.xlane.xlu1 %65  ;;  %v1782_v10 = vpop.xlane.xlu0 %86 }
  0xed   :  { %v1069_v31 = vpop.eup %1068  ;;  %1080 = vlog2.f32 %v843_v58  ;;  %vm1741_vm0 = vcmp.lt.f32.partialorder %v350_v28, 0.0004427343  ;;  %vm1745_vm1 = vcmp.lt.f32.partialorder %v600_v41, 0.0004427343  ;;  %v357_v34 = vadd.f32 1.0, %v356_v16 }
  0xee   :  { %v1071_v3 = vpop.eup %1070  ;;  %1082 = vpow2.f32 %v801_v26  ;;  %v781_v12 = vand.u32 2147483647, %v765_v42  ;;  %v766_v49 = vsub.f32 0.0, %v1716_v54  ;;  %v833_v29 = vsel %vm1705_vm15, %v830_v23, %v827_v30 }
  0xef   :  { %v1754_v24 = vpop.eup %1072  ;;  %vm1758_vm2 = vcmp.lt.f32.partialorder %v840_v48, 0.0004427343  ;;  %1084 = vlog2.f32 %v603_v59  ;;  %v1764_v55 = vmin.f32 %v508_v51, 0.0  ;;  %v836_v37 = vmul.f32 0.6931472, %v1069_v31 }
  0xf0   :  { %v1075_v57 = vpop.eup %1074  ;;  %v839_v1 = vmul.f32 %v1628_v13, %v838_v22  ;;  %v359_v9 = vand.u32 2147483647, %v1690_v20  ;;  %v789_v60 = vsub.f32 0.0, %v781_v12  ;;  %v632_v27 = vadd.f32 %v624_v25, %v374_v47 }
  0xf1   :  { %v1770_v50 = vmin.f32 %v764_v36, 0.0  ;;  %v782_v8 = vand.u32 2147483647, %v766_v49  ;;  %v68_v61 = vand.u32 2147483647, %v1752_v17  ;;  %v881_v51 = vsub.f32 %v1577_v39, %v833_v29 }
  0xf2   :  { %v1775_v4 = vpop.eup %1076  ;;  %v346_v28 = vmul.f32 0.6931472, %v1071_v3  ;;  %v1779_v13 = vmul.f32 %v1690_v20, %v357_v34  ;;  %v362_v52 = vadd.f32 1.0, %v1754_v24  ;;  %v596_v19 = vmul.f32 0.6931472, %v1075_v57 }
  0xf3   :  { %v803_v14 = vmul.f32 1.442695, %v789_v60  ;;  %v790_v62 = vsub.f32 0.0, %v782_v8  ;;  %v69_v36 = vsub.f32 0.0, %v68_v61  ;;  %v842_v41 = vsel %vm1758_vm2, %v839_v1, %v836_v37 }
  0xf4   :  { %v606_v58 = vmul.f32 -0.5, %v1700_v63  ;;  %v846_v44 = vmul.f32 -0.5, %v1711_v46  ;;  %v48_v39 = vand.u32 2147483647, %v1739_v2  ;;  %v612_v20 = vadd.f32 1.0, %v1775_v4 }
  0xf5   :  { %1086 = vpow2.f32 %v803_v14  ;;  %v805_v16 = vmul.f32 1.442695, %v790_v62  ;;  %v70_v26 = vmul.f32 1.442695, %v69_v36  ;;  %v1079_v25 = vpop.eup %1078  ;;  %vm1790_vm3 = vcmp.lt.f32.partialorder %v359_v9, 0.0004427343 }
  0xf6   :  { %v609_v48 = vand.u32 2147483647, %v1700_v63  ;;  %1088 = vlog2.f32 %v362_v52  ;;  %v49_v59 = vsub.f32 0.0, %v48_v39  ;;  %v89_v23 = vand.u32 2147483647, %v1782_v10 }
  0xf7   :  { %v1081_v22 = vpop.eup %1080  ;;  %v1797_v31 = vadd.f32 %v881_v51, %v1680_v38  ;;  %v352_v47 = vsel %vm1741_vm0, %v1734_v0, %v346_v28  ;;  %v602_v3 = vsel %vm1745_vm1, %v1737_v43, %v596_v19  ;;  %1090 = vpow2.f32 %v805_v16 }
  0xf8   :  { %v1805_v34 = vpop.eup %1082  ;;  %v882_v12 = vsub.f32 %v1664_v32, %v842_v41  ;;  %1092 = vpow2.f32 %v70_v26  ;;  %v50_v29 = vmul.f32 1.442695, %v49_v59  ;;  %v90_v11 = vsub.f32 0.0, %v89_v23 }
  0xf9   :  { %v1085_v57 = vpop.eup %1084  ;;  %v847_v37 = vadd.f32 1.0, %v846_v44  ;;  %v365_v38 = vmul.f32 -0.5, %v1754_v24  ;;  %1094 = vlog2.f32 %v612_v20  ;;  %v852_v6 = vadd.f32 1.0, %v1805_v34 }
  0xfa   :  { %v607_v0 = vadd.f32 1.0, %v606_v58  ;;  %v849_v1 = vand.u32 2147483647, %v1711_v46  ;;  %1096 = vpow2.f32 %v50_v29  ;;  %v91_v43 = vmul.f32 1.442695, %v90_v11 }
  0xfb   :  { %v626_v21 = vsub.f32 %v1649_v18, %v602_v3  ;;  %v355_v9 = vmul.f32 0.6931472, %v1079_v25  ;;  %v845_v60 = vmul.f32 0.6931472, %v1081_v22  ;;  %1098 = vlog2.f32 %v852_v6 }
  0xfc   :  { %v376_v32 = vsub.f32 %v1641_v35, %v352_v47  ;;  %v605_v8 = vmul.f32 0.6931472, %v1085_v57  ;;  %vm1813_vm4 = vcmp.lt.f32.partialorder %v609_v48, 0.0004427343  ;;  %1100 = vpow2.f32 %v91_v43 }
  0xfd   :  { %v1817_v51 = vadd.f32 %v882_v12, %v632_v27  ;;  %v848_v28 = vmul.f32 %v1711_v46, %v847_v37  ;;  %v366_v52 = vadd.f32 1.0, %v365_v38  ;;  %v368_v19 = vand.u32 2147483647, %v1754_v24 }
  0xfe   :  { %v608_v18 = vmul.f32 %v1700_v63, %v607_v0  ;;  %vm1822_vm5 = vcmp.lt.f32.partialorder %v849_v1, 0.0004427343  ;;  %v855_v35 = vmul.f32 -0.5, %v1805_v34  ;;  %v1829_v62 = vmin.f32 %v765_v42, 0.0 }
  0xff   :  { %v1831_v36 = vpop.eup %1086  ;;  %v928_v46 = vrot.slane %v1797_v31, %v1393_v33  ;;  %v1835_v27 = vadd.f32 %v626_v21, %v376_v32  ;;  %v361_v63 = vsel %vm1790_vm3, %v1779_v13, %v355_v9  ;;  %v851_v41 = vsel %vm1822_vm5, %v848_v28, %v845_v60 }
 0x100   :  { %v1089_v58 = vpop.eup %1088  ;;  %v611_v15 = vsel %vm1813_vm4, %v608_v18, %v605_v8  ;;  %v615_v42 = vmul.f32 -0.5, %v1775_v4  ;;  %v618_v44 = vand.u32 2147483647, %v1775_v4  ;;  %v861_v39 = vadd.f32 1.0, %v1831_v36 }
 0x101   :  { %vm951_vm6 = vcmask 1042434   ;;  %v1847_v20 = vpop.eup %1090  ;;  %v932_v16 = vrot.slane %v1817_v51, %v1393_v33  ;;  %v367_v13 = vmul.f32 %v1754_v24, %v366_v52  ;;  %vm1852_vm7 = vcmp.lt.f32.partialorder %v368_v19, 0.0004427343 }
 0x102   :  { %v67_v25 = vmin.f32 %v1752_v17, 0.0  ;;  %vm953_vm8 = vcmask 1043459   ;;  %v1857_v30 = vpop.eup %1092  ;;  %v377_v48 = vsub.f32 %v1668_v40, %v361_v63  ;;  %v883_v59 = vsub.f32 %v1688_v53, %v851_v41 }
 0x103   :  { %v856_v23 = vadd.f32 1.0, %v855_v35  ;;  %1102 = vlog2.f32 %v861_v39  ;;  %v1095_v22 = vpop.eup %1094  ;;  %v627_v47 = vsub.f32 %v1672_v45, %v611_v15  ;;  %v858_v24 = vand.u32 2147483647, %v1805_v34 }
 0x104   :  { %v870_v3 = vadd.f32 1.0, %v1847_v20  ;;  %v72_v12 = vadd.f32 1.0, %v1857_v30  ;;  %vm955_vm9 = vcmask 1044484   ;;  %v1865_v29 = vpop.eup %1096  ;;  %v616_v11 = vadd.f32 1.0, %v615_v42 }
 0x105   :  { %vm1867_vm10 = vcmp.lt.f32.partialorder %v618_v44, 0.0004427343  ;;  %v1873_v40 = vmin.f32 %v766_v49, 0.0  ;;  %v47_v45 = vmin.f32 %v1739_v2, 0.0  ;;  %v1099_v53 = vpop.eup %1098  ;;  %v364_v37 = vmul.f32 0.6931472, %v1089_v58 }
 0x106   :  { %v864_v38 = vmul.f32 -0.5, %v1831_v36  ;;  %1104 = vlog2.f32 %v870_v3  ;;  %v52_v6 = vadd.f32 1.0, %v1865_v29  ;;  %v1878_v0 = vpop.eup %1100  ;;  %v891_v1 = vadd.f32 %v883_v59, %v1620_v7 }
 0x107   :  { %v854_v43 = vmul.f32 0.6931472, %v1099_v53  ;;  %v857_v21 = vmul.f32 %v1805_v34, %v856_v23  ;;  %1106 = vlog2.f32 %v72_v12  ;;  %v635_v54 = vadd.f32 %v627_v47, %v377_v48 }
 0x108   :  { %v614_v49 = vmul.f32 0.6931472, %v1095_v22  ;;  %vm859_vm11 = vcmp.lt.f32.partialorder %v858_v24, 0.0004427343  ;;  %1108 = vlog2.f32 %v52_v6  ;;  %v617_v9 = vmul.f32 %v1775_v4, %v616_v11 }
 0x109   :  { %v860_v60 = vsel %vm859_vm11, %v857_v21, %v854_v43  ;;  %v873_v32 = vmul.f32 -0.5, %v1847_v20  ;;  %v93_v8 = vadd.f32 1.0, %v1878_v0  ;;  %v370_v61 = vsel %vm1852_vm7, %v367_v13, %v364_v37 }
 0x10a   :  { %v884_v7 = vsub.f32 %v1770_v50, %v860_v60  ;;  %v865_v51 = vadd.f32 1.0, %v864_v38  ;;  %v75_v34 = vmul.f32 -0.5, %v1857_v30  ;;  %v936_v28 = vrot.slane %v891_v1, %v1393_v33 }
 0x10b   :  { %v867_v52 = vand.u32 2147483647, %v1831_v36  ;;  %v55_v19 = vmul.f32 -0.5, %v1865_v29  ;;  %1110 = vlog2.f32 %v93_v8  ;;  %vm957_vm12 = vcmask 1045509  }
 0x10c   :  { %v620_v4 = vsel %vm1867_vm10, %v617_v9, %v614_v49  ;;  %v876_v18 = vand.u32 2147483647, %v1847_v20  ;;  %v78_v14 = vand.u32 2147483647, %v1857_v30  ;;  %v952_v50 = vsel %vm951_vm6, %v928_v46, %v1698_v5 }
 0x10d   :  { %vm959_vm13 = vcmask 1046534   ;;  %v1103_v35 = vpop.eup %1102  ;;  %v378_v63 = vsub.f32 %v1730_v56, %v370_v61  ;;  %v874_v41 = vadd.f32 1.0, %v873_v32  ;;  %v96_v58 = vmul.f32 -0.5, %v1878_v0 }
 0x10e   :  { %v954_v15 = vsel %vm953_vm8, %v932_v16, %v952_v50  ;;  %v892_v42 = vadd.f32 %v884_v7, %v1835_v27  ;;  %v863_v44 = vmul.f32 0.6931472, %v1103_v35  ;;  %v866_v39 = vmul.f32 %v1831_v36, %v865_v51 }
 0x10f   :  { %v76_v13 = vadd.f32 1.0, %v75_v34  ;;  %v628_v26 = vsub.f32 %v1764_v55, %v620_v4  ;;  %vm868_vm14 = vcmp.lt.f32.partialorder %v867_v52, 0.0004427343  ;;  %v56_v31 = vadd.f32 1.0, %v55_v19 }
 0x110   :  { %v956_v5 = vsel %vm955_vm9, %v936_v28, %v954_v15  ;;  %v1105_v46 = vpop.eup %1104  ;;  %v869_v48 = vsel %vm868_vm14, %v866_v39, %v863_v44  ;;  %vm1908_vm15 = vcmp.lt.f32.partialorder %v876_v18, 0.0004427343  ;;  %vm1912_vm0 = vcmp.lt.f32.partialorder %v78_v14, 0.0004427343 }
 0x111   :  { %v58_v27 = vand.u32 2147483647, %v1865_v29  ;;  %v1107_v36 = vpop.eup %1106  ;;  %v885_v59 = vsub.f32 %v1829_v62, %v869_v48  ;;  %v872_v55 = vmul.f32 0.6931472, %v1105_v46  ;;  %v875_v23 = vmul.f32 %v1847_v20, %v874_v41 }
 0x112   :  { %v97_v22 = vadd.f32 1.0, %v96_v58  ;;  %v1109_v47 = vpop.eup %1108  ;;  %v940_v24 = vrot.slane %v892_v42, %v1393_v33  ;;  %v74_v3 = vmul.f32 0.6931472, %v1107_v36  ;;  %v77_v12 = vmul.f32 %v1857_v30, %v76_v13 }
 0x113   :  { %v99_v11 = vand.u32 2147483647, %v1878_v0  ;;  %v893_v57 = vadd.f32 %v885_v59, %v635_v54  ;;  %v878_v53 = vsel %vm1908_vm15, %v875_v23, %v872_v55  ;;  %v54_v37 = vmul.f32 0.6931472, %v1109_v47 }
 0x114   :  { %v57_v38 = vmul.f32 %v1865_v29, %v56_v31  ;;  %v636_v62 = vadd.f32 %v628_v26, %v378_v63  ;;  %v886_v6 = vsub.f32 %v1873_v40, %v878_v53  ;;  %v80_v20 = vsel %vm1912_vm0, %v77_v12, %v74_v3 }
 0x115   :  { %vm59_vm1 = vcmp.lt.f32.partialorder %v58_v27, 0.0004427343  ;;  %v1111_v1 = vpop.eup %1110  ;;  %v81_v30 = vsub.f32 %v67_v25, %v80_v20  ;;  %v98_v21 = vmul.f32 %v1878_v0, %v97_v22  ;;  %v944_v54 = vrot.slane %v893_v57, %v1393_v33 }
 0x116   :  { %v60_v43 = vsel %vm59_vm1, %v57_v38, %v54_v37  ;;  %v894_v49 = vadd.f32 %v886_v6, %v636_v62  ;;  %v95_v9 = vmul.f32 0.6931472, %v1111_v1  ;;  %v958_v40 = vsel %vm957_vm12, %v940_v24, %v956_v5 }
 0x117   :  { %v61_v29 = vsub.f32 %v47_v45, %v60_v43  ;;  %v88_v60 = vmin.f32 %v1782_v10, 0.0  ;;  %vm100_vm2 = vcmp.lt.f32.partialorder %v99_v11, 0.0004427343  ;;  %v960_v32 = vsel %vm959_vm13, %v944_v54, %v958_v40 }
 0x118   :  { %vm961_vm3 = vcmask 1047559   ;;  %v101_v17 = vsel %vm100_vm2, %v98_v21, %v95_v9  ;;  %v948_v25 = vrot.slane %v894_v49, %v1393_v33  ;;  %vm965_vm4 = vcmask 23552  }
 0x119   :  { %v102_v0 = vsub.f32 %v88_v60, %v101_v17  ;;  %v82_v8 = vadd.f32 %v81_v30, %v61_v29  ;;  %vm896_vm5 = vcmask 7168  }
 0x11a   :  { %v962_v61 = vsel %vm961_vm3, %v948_v25, %v960_v32 }
 0x11b   :  { %v966_v7 = vsel %vm965_vm4, %v962_v61, 0.0  ;;  %v103_v2 = vadd.f32 %v102_v0, %v82_v8 }
 0x11c   :  { %967 = vadd.xlane.f32.xlu0 %v966_v7 }
 0x11d   :  { %v897_v45 = vsel %vm896_vm5, %v103_v2, 0.0 }
 0x11e   :  { %898 = vadd.xlane.f32.xlu1 %v897_v45 }
 0x1a9   :  { %v968_v51 = vpop.xlane.xlu0 %967 }
 0x1aa   :  { %v969_v34 = vrot.slane %v968_v51, 4 }
 0x1ab   :  { %v899_v10 = vpop.xlane.xlu1 %898 }
 0x1ac   :  { %v970_v28 = vadd.f32 %v969_v34, %v968_v51  ;;  %v900_v52 = vrot.slane %v899_v10, 4 }
 0x1ae   :  { %v971_v19 = vrot.slane %v970_v28, 2  ;;  %v901_v4 = vadd.f32 %v900_v52, %v899_v10 }
 0x1b0   :  { %v972_v18 = vadd.f32 %v971_v19, %v970_v28  ;;  %v902_v14 = vrot.slane %v901_v4, 2 }
 0x1b2   :  { %v903_v33 = vadd.f32 %v902_v14, %v901_v4  ;;  %v973_v50 = vrot.slane %v972_v18, 1 }
 0x1b4   :  { %v904_v35 = vrot.slane %v903_v33, 1  ;;  %v974_v41 = vadd.f32 %v973_v50, %v972_v18 }
 0x1b6   :  { %v905_v63 = vadd.f32 %v904_v35, %v903_v33 }
 0x1b8   :  { %994 = vpush %v905_v63 }
 0x1b9   :  { %996 = vpush %v974_v41 }
 0x1e9   :  { %s995_s5 = spop %994 }
 0x1ea   :  { %s997_s19 = spop %996 }
 0x1eb   :  { %s976_s20 = sadd.f32 %s997_s19, %s995_s5 }
 0x1ed   :  { %s978_s21 = ssub.f32 0.0, %s976_s20 }
 0x1ef   :  { %980 = sst [smem:[#allocation2]] %s978_s21 }
 0x1f0   :  { %1121 = shalt.err (!%p1118_p2)
}
 0x1f1   :  { %s1125_s2 = smov [#allocation2]  }
 0x1f2   :  { %988 = dma.smem_to_hbm %s1125_s2, 16, %s1956_s6, [#allocation3]  }
 0x1f3   :  { %1122 = dma.done.wait [#allocation3], 16  }
 0x1f4   :  { %1123 = vsyncadd [#allocation3], 4294967280 }
 0x1f5   :  { %992 = sfence }
 0x1f6   :  { %993 = vsyncpa [#allocation3], 1 }

</bundles_post_ra>
